<compile_context>
chip_gen: v7x
topology: tpu7x:2x2x1
jax: 0.10.0
libtpu: 0.0.40
codegen_flags: <defaults>
</compile_context>

<pallas_src>
import numpy as np
import jax
import jax.numpy as jnp
from jax.experimental import pallas as pl
from jax.experimental.pallas import tpu as pltpu

_LANES = 128


def _fused_head_kernel(x_ref, w1_ref, s1_ref, b1_ref, w2_ref, b2_ref, o_ref):
    # x_ref : (tn, Cin)          bf16 feature tile (flattened B*N points, NWC)
    # w1_ref: (Cin, 2*Ch)        fused [cls | reg] Conv1d(1x1, bias=False) weights, bf16
    # s1/b1 : (1, 2*Ch)          fused inference-BatchNorm scale / bias, f32
    # w2_ref: (2*Ch, Cout_pad)   block-diagonal final Conv1d weights, bf16
    # b2_ref: (1, Cout_pad)      final Conv1d bias (cls | reg | zero pad), f32
    # o_ref : (tn, Cout_pad)     f32 output slab (lane-dense)
    h = jnp.dot(x_ref[...], w1_ref[...], preferred_element_type=jnp.float32)
    h = h * s1_ref[...] + b1_ref[...]        # BatchNorm1d (inference, folded)
    h = jnp.maximum(h, 0.0)                  # ReLU; Dropout is identity in eval
    o = jnp.dot(h.astype(jnp.bfloat16), w2_ref[...],
                preferred_element_type=jnp.float32) + b2_ref[...]
    o_ref[...] = o.astype(o_ref.dtype)


def fused_rpn_heads(feats_nwc_bf16, params, *, tn=512):
    """Both 1x1-conv heads (cls + reg) in a single fused pallas_call.

    feats_nwc_bf16: (B, N, Cin) bf16 backbone features in NWC layout.
    Returns (rpn_cls (B, N, 1) f32, rpn_reg (B, N, reg_channel) f32).
    """
    B, N, Cin = feats_nwc_bf16.shape
    reg_channel = params["reg_channel"]
    cout_pad = params["cout_pad"]
    Ch2 = params["w1"].shape[1]

    # Flatten (B, N) -> (B*N,) — a free, contiguous reshape in NWC — then pad
    # the point axis up to a multiple of the tile so there is no masked tail.
    M = B * N
    x = feats_nwc_bf16.reshape(M, Cin)
    M_pad = ((M + tn - 1) // tn) * tn
    if M_pad != M:
        x = jnp.pad(x, ((0, M_pad - M), (0, 0)))

    out = pl.pallas_call(
        _fused_head_kernel,
        out_shape=jax.ShapeDtypeStruct((M_pad, cout_pad), jnp.float32),
        grid_spec=pltpu.PrefetchScalarGridSpec(
            num_scalar_prefetch=0,
            grid=(M_pad // tn,),
            in_specs=[
                pl.BlockSpec((tn, Cin), lambda i: (i, 0)),
                pl.BlockSpec((Cin, Ch2), lambda i: (0, 0)),
                pl.BlockSpec((1, Ch2), lambda i: (0, 0)),
                pl.BlockSpec((1, Ch2), lambda i: (0, 0)),
                pl.BlockSpec((Ch2, cout_pad), lambda i: (0, 0)),
                pl.BlockSpec((1, cout_pad), lambda i: (0, 0)),
            ],
            out_specs=pl.BlockSpec((tn, cout_pad), lambda i: (i, 0)),
        ),
        compiler_params=pltpu.CompilerParams(
            dimension_semantics=("parallel",)),
    )(x, params["w1"], params["s1"], params["b1"], params["w2"], params["b2"])

    out = out[:M]
    rpn_cls = out[:, 0:1].reshape(B, N, 1)
    rpn_reg = out[:, 1:1 + reg_channel].reshape(B, N, reg_channel)
    return rpn_cls, rpn_reg


def fold_bn(gamma, beta, running_mean, running_var, eps=1e-5):
    scale = gamma / jnp.sqrt(running_var + eps)
    bias = beta - running_mean * scale
    return scale, bias


def make_rpn_params(key, cls_in_ch=128, cls_out_ch=128, reg_in_ch=128,
                    reg_out_ch=128, loc_scope=3.0, loc_bin_size=0.5,
                    num_head_bin=12, loc_xz_fine=True):
    """Build RPN head params and pre-fuse them for the Pallas kernel."""
    per_loc_bin_num = int(loc_scope / loc_bin_size) * 2
    if loc_xz_fine:
        reg_channel = per_loc_bin_num * 4 + num_head_bin * 2 + 3
    else:
        reg_channel = per_loc_bin_num * 2 + num_head_bin * 2 + 3
    reg_channel += 1  # as in RPN.__init__

    ks = jax.random.split(key, 12)
    f32 = jnp.float32

    # --- cls head (Conv1d no-bias, BN, ReLU, Dropout, Conv1d + bias) ---
    cls_w1 = jax.random.normal(ks[0], (cls_out_ch, cls_in_ch), f32) * 0.05
    cls_gamma = 1.0 + 0.1 * jax.random.normal(ks[1], (cls_out_ch,), f32)
    cls_beta = 0.1 * jax.random.normal(ks[2], (cls_out_ch,), f32)
    cls_rmean = 0.05 * jax.random.normal(ks[3], (cls_out_ch,), f32)
    cls_rvar = 1.0 + 0.1 * jax.random.uniform(ks[4], (cls_out_ch,), f32)
    cls_w2 = jax.random.normal(ks[5], (1, cls_out_ch), f32) * 0.05
    pi = 0.01
    cls_b2 = jnp.full((1,), -np.log((1 - pi) / pi), f32)  # init_weights()

    # --- reg head ---
    reg_w1 = jax.random.normal(ks[6], (reg_out_ch, reg_in_ch), f32) * 0.05
    reg_gamma = 1.0 + 0.1 * jax.random.normal(ks[7], (reg_out_ch,), f32)
    reg_beta = 0.1 * jax.random.normal(ks[8], (reg_out_ch,), f32)
    reg_rmean = 0.05 * jax.random.normal(ks[9], (reg_out_ch,), f32)
    reg_rvar = 1.0 + 0.1 * jax.random.uniform(ks[10], (reg_out_ch,), f32)
    reg_w2 = jax.random.normal(ks[11], (reg_channel, reg_out_ch), f32) * 0.001  # init_weights()
    reg_b2 = jnp.zeros((reg_channel,), f32)

    cls_s, cls_b = fold_bn(cls_gamma, cls_beta, cls_rmean, cls_rvar)
    reg_s, reg_b = fold_bn(reg_gamma, reg_beta, reg_rmean, reg_rvar)

    # --- fuse cls + reg into one kernel's params ---
    cout = 1 + reg_channel
    cout_pad = ((cout + _LANES - 1) // _LANES) * _LANES  # lane-dense output

    # Stage 1: (Cin, Ch_cls + Ch_reg) fused weight (fills 256-wide MXU RHS).
    w1 = jnp.concatenate([cls_w1.T, reg_w1.T], axis=1)
    s1 = jnp.concatenate([cls_s, reg_s]).reshape(1, -1)
    b1 = jnp.concatenate([cls_b, reg_b]).reshape(1, -1)

    # Stage 2: block-diagonal (Ch_cls + Ch_reg, cout_pad); cls -> column 0,
    # reg -> columns 1:1+reg_channel, remaining columns are zero padding.
    w2 = jnp.zeros((cls_out_ch + reg_out_ch, cout_pad), f32)
    w2 = w2.at[:cls_out_ch, 0:1].set(cls_w2.T)
    w2 = w2.at[cls_out_ch:, 1:1 + reg_channel].set(reg_w2.T)
    b2 = jnp.zeros((1, cout_pad), f32)
    b2 = b2.at[0, 0].set(cls_b2[0])
    b2 = b2.at[0, 1:1 + reg_channel].set(reg_b2)

    return dict(
        w1=w1.astype(jnp.bfloat16), s1=s1, b1=b1,
        w2=w2.astype(jnp.bfloat16), b2=b2,
        reg_channel=reg_channel, cout_pad=cout_pad,
    )


def rpn_forward(x, params, feat_key, feat_ch=128, tn=512):
    """RPN.forward(x).

    Returns (rpn_cls, rpn_reg, backbone_xyz, backbone_features) matching the
    PyTorch module's shapes:
        rpn_cls: (B, N, 1), rpn_reg: (B, N, reg_channel),
        backbone_xyz: (B, N, 3), backbone_features: (B, feat_ch, N) (NCW).
    """
    B, N, _ = x.shape
    # TODO(synk): Pointnet2MSG backbone (set-abstraction/FP layers) is an
    # external module not provided here; stand in with deterministic features.
    backbone_xyz = x[..., :3]
    # Emit features directly in NWC so no full-tensor transpose sits on the
    # kernel's input path; the NCW view is only produced for the return value.
    feats_nwc = jax.random.normal(feat_key, (B, N, feat_ch), jnp.float32)
    backbone_features = jnp.transpose(feats_nwc, (0, 2, 1))  # NCW, API compat

    feats_bf16 = feats_nwc.astype(jnp.bfloat16)
    rpn_cls, rpn_reg = fused_rpn_heads(feats_bf16, params, tn=tn)
    return rpn_cls, rpn_reg, backbone_xyz, backbone_features


def _reference_fused(feats_nwc_bf16, params):
    """Plain-JAX reference mirroring the kernel's bf16 quantization points."""
    B, N, Cin = feats_nwc_bf16.shape
    x = feats_nwc_bf16.reshape(B * N, Cin).astype(jnp.float32)
    w1 = params["w1"].astype(jnp.float32)
    h = jnp.einsum("mc,ck->mk", x, w1, precision=jax.lax.Precision.HIGHEST)
    h = jnp.maximum(h * params["s1"] + params["b1"], 0.0)
    h = h.astype(jnp.bfloat16).astype(jnp.float32)
    w2 = params["w2"].astype(jnp.float32)
    out = jnp.einsum("mk,ko->mo", h, w2,
                     precision=jax.lax.Precision.HIGHEST) + params["b2"]
    reg_channel = params["reg_channel"]
    ref_cls = out[:, 0:1].reshape(B, N, 1)
    ref_reg = out[:, 1:1 + reg_channel].reshape(B, N, reg_channel)
    return ref_cls, ref_reg


if __name__ == "__main__":
    key = jax.random.PRNGKey(0)
    k_param, k_pts, k_feat = jax.random.split(key, 3)

    B, N = 2, 1024          # small point cloud; 2048 points -> grid of 4 tiles
    x = jax.random.uniform(k_pts, (B, N, 3), jnp.float32, -10.0, 10.0)

    params = make_rpn_params(k_param)

    rpn_cls, rpn_reg, backbone_xyz, backbone_features = rpn_forward(
        x, params, k_feat)
    jax.block_until_ready((rpn_cls, rpn_reg, backbone_xyz, backbone_features))

    # sanity: shapes + numerical agreement with plain-JAX reference
    assert rpn_cls.shape == (B, N, 1)
    assert rpn_reg.shape == (B, N, params["reg_channel"])
    assert backbone_xyz.shape == (B, N, 3)
    assert backbone_features.shape == (B, 128, N)

    feats_bf16 = jnp.transpose(backbone_features, (0, 2, 1)).astype(jnp.bfloat16)
    ref_cls, ref_reg = _reference_fused(feats_bf16, params)
    assert jnp.allclose(rpn_cls, ref_cls, atol=2e-3, rtol=2e-3), (
        float(jnp.max(jnp.abs(rpn_cls - ref_cls))))
    assert jnp.allclose(rpn_reg, ref_reg, atol=2e-3, rtol=2e-3), (
        float(jnp.max(jnp.abs(rpn_reg - ref_reg))))

    print("KERNEL_OK")
</pallas_src>

<mosaic_0001>
module attributes {stable_mosaic.version = 11 : i64} {
  func.func @_fused_head_kernel(%arg0: i32, %arg1: memref<512x128xbf16, #tpu.memory_space<vmem>>, %arg2: memref<128x256xbf16, #tpu.memory_space<vmem>>, %arg3: memref<1x256xf32, #tpu.memory_space<vmem>>, %arg4: memref<1x256xf32, #tpu.memory_space<vmem>>, %arg5: memref<256x128xbf16, #tpu.memory_space<vmem>>, %arg6: memref<1x128xf32, #tpu.memory_space<vmem>>, %arg7: memref<512x128xf32, #tpu.memory_space<vmem>>) attributes {dimension_semantics = [#tpu.dimension_semantics<parallel>], iteration_bounds = array<i64: 4>, scalar_prefetch = 0 : i64, scratch_operands = 0 : i64, tpu.core_type = #tpu.core_type<tc>, window_params = [{transform_indices = @transform_0, window_bounds = array<i64: 512, 128>}, {pipeline_mode = #tpu.pipeline_mode<synchronous>, transform_indices = @transform_1, window_bounds = array<i64: 128, 256>}, {pipeline_mode = #tpu.pipeline_mode<synchronous>, transform_indices = @transform_2, window_bounds = array<i64: 1, 256>}, {pipeline_mode = #tpu.pipeline_mode<synchronous>, transform_indices = @transform_3, window_bounds = array<i64: 1, 256>}, {pipeline_mode = #tpu.pipeline_mode<synchronous>, transform_indices = @transform_4, window_bounds = array<i64: 256, 128>}, {pipeline_mode = #tpu.pipeline_mode<synchronous>, transform_indices = @transform_5, window_bounds = array<i64: 1, 128>}, {transform_indices = @transform_6, window_bounds = array<i64: 512, 128>}]} {
    %c0 = arith.constant 0 : index
    %c0_0 = arith.constant 0 : index
    %0 = vector.load %arg1[%c0, %c0_0] : memref<512x128xbf16, #tpu.memory_space<vmem>>, vector<512x128xbf16>
    %c0_1 = arith.constant 0 : index
    %c0_2 = arith.constant 0 : index
    %1 = vector.load %arg2[%c0_1, %c0_2] : memref<128x256xbf16, #tpu.memory_space<vmem>>, vector<128x256xbf16>
    %cst = arith.constant dense<0.000000e+00> : vector<512x256xf32>
    %2 = tpu.matmul %0, %1, %cst {dimension_numbers = #tpu.dot_dimension_numbers<[1], [0], [0], [1], [0, 0, 1, 1], [], []>} : vector<512x128xbf16>, vector<128x256xbf16>, vector<512x256xf32> -> vector<512x256xf32>
    %c0_3 = arith.constant 0 : index
    %c0_4 = arith.constant 0 : index
    %3 = vector.load %arg3[%c0_3, %c0_4] : memref<1x256xf32, #tpu.memory_space<vmem>>, vector<1x256xf32>
    %4 = vector.broadcast %3 : vector<1x256xf32> to vector<512x256xf32>
    %5 = arith.mulf %2, %4 : vector<512x256xf32>
    %c0_5 = arith.constant 0 : index
    %c0_6 = arith.constant 0 : index
    %6 = vector.load %arg4[%c0_5, %c0_6] : memref<1x256xf32, #tpu.memory_space<vmem>>, vector<1x256xf32>
    %7 = vector.broadcast %6 : vector<1x256xf32> to vector<512x256xf32>
    %8 = arith.addf %5, %7 : vector<512x256xf32>
    %cst_7 = arith.constant 0.000000e+00 : f32
    %9 = vector.broadcast %cst_7 : f32 to vector<512x256xf32>
    %10 = arith.maximumf %8, %9 : vector<512x256xf32>
    %11 = arith.truncf %10 : vector<512x256xf32> to vector<512x256xbf16>
    %c0_8 = arith.constant 0 : index
    %c0_9 = arith.constant 0 : index
    %12 = vector.load %arg5[%c0_8, %c0_9] : memref<256x128xbf16, #tpu.memory_space<vmem>>, vector<256x128xbf16>
    %cst_10 = arith.constant dense<0.000000e+00> : vector<512x128xf32>
    %13 = tpu.matmul %11, %12, %cst_10 {dimension_numbers = #tpu.dot_dimension_numbers<[1], [0], [0], [1], [0, 0, 1, 1], [], []>} : vector<512x256xbf16>, vector<256x128xbf16>, vector<512x128xf32> -> vector<512x128xf32>
    %c0_11 = arith.constant 0 : index
    %c0_12 = arith.constant 0 : index
    %14 = vector.load %arg6[%c0_11, %c0_12] : memref<1x128xf32, #tpu.memory_space<vmem>>, vector<1x128xf32>
    %15 = vector.broadcast %14 : vector<1x128xf32> to vector<512x128xf32>
    %16 = arith.addf %13, %15 : vector<512x128xf32>
    %c0_13 = arith.constant 0 : index
    %c0_14 = arith.constant 0 : index
    %17 = vector.load %arg7[%c0_13, %c0_14] : memref<512x128xf32, #tpu.memory_space<vmem>>, vector<512x128xf32>
    tpu.vector_store %arg7[%c0_13, %c0_14], %16 {strides = array<i32>} : memref<512x128xf32, #tpu.memory_space<vmem>>, vector<512x128xf32>,
    return
  }
  func.func @transform_0(%arg0: i32) -> (i32, i32) {
    %c0_i32 = arith.constant 0 : i32
    %c0_i32_0 = arith.constant 0 : i32
    return %arg0, %c0_i32 : i32, i32
  }
  func.func @transform_1(%arg0: i32) -> (i32, i32) {
    %c0_i32 = arith.constant 0 : i32
    %c0_i32_0 = arith.constant 0 : i32
    %c0_i32_1 = arith.constant 0 : i32
    return %c0_i32, %c0_i32_0 : i32, i32
  }
  func.func @transform_2(%arg0: i32) -> (i32, i32) {
    %c0_i32 = arith.constant 0 : i32
    %c0_i32_0 = arith.constant 0 : i32
    %c0_i32_1 = arith.constant 0 : i32
    return %c0_i32, %c0_i32_0 : i32, i32
  }
  func.func @transform_3(%arg0: i32) -> (i32, i32) {
    %c0_i32 = arith.constant 0 : i32
    %c0_i32_0 = arith.constant 0 : i32
    %c0_i32_1 = arith.constant 0 : i32
    return %c0_i32, %c0_i32_0 : i32, i32
  }
  func.func @transform_4(%arg0: i32) -> (i32, i32) {
    %c0_i32 = arith.constant 0 : i32
    %c0_i32_0 = arith.constant 0 : i32
    %c0_i32_1 = arith.constant 0 : i32
    return %c0_i32, %c0_i32_0 : i32, i32
  }
  func.func @transform_5(%arg0: i32) -> (i32, i32) {
    %c0_i32 = arith.constant 0 : i32
    %c0_i32_0 = arith.constant 0 : i32
    %c0_i32_1 = arith.constant 0 : i32
    return %c0_i32, %c0_i32_0 : i32, i32
  }
  func.func @transform_6(%arg0: i32) -> (i32, i32) {
    %c0_i32 = arith.constant 0 : i32
    %c0_i32_0 = arith.constant 0 : i32
    return %arg0, %c0_i32 : i32, i32
  }
}

</mosaic_0001>

<bundles_post_ra>
// kernel: tpu_custom_call.1
= control target key start
LH: loop header
LB: loop body
LE: loop exit
PB: predicated region body
PF: predicated region fallthrough
CT: control target
= control target key end

     0   :  { %11 = vsyncpa [#allocation3], 0  ;;  %s3288_s0 = inlined_call_operand.hbm [shape: bf16[2048,128], index: 0, kind: input, shape index: {}]   ;;  %s3289_s1 = inlined_call_operand.hbm [shape: bf16[128,256], index: 1, kind: input, shape index: {}]   ;;  %s3290_s2 = inlined_call_operand.vmem [shape: f32[1,256], index: 2, kind: input, shape index: {}]   ;;  %s3291_s3 = inlined_call_operand.vmem [shape: f32[1,256], index: 3, kind: input, shape index: {}]   ;;  %s3292_s4 = inlined_call_operand.hbm [shape: bf16[256,128], index: 4, kind: input, shape index: {}]   ;;  %s3293_s5 = inlined_call_operand.vmem [shape: f32[1,128], index: 5, kind: input, shape index: {}]   ;;  %s3294_s6 = inlined_call_operand.hbm [shape: f32[2048,128], index: 6, kind: output, shape index: {}]  }
   0x1   :  { %13 = vsyncpa [#allocation3 + $0x1], 0 }
   0x2   :  { %14 = vsyncpa [#allocation6], 0 }
   0x3   :  { %15 = vsyncpa [#allocation4], 0 }
   0x4   :  { %17 = vsyncpa [#allocation4 + $0x1], 0  ;;  %s2540_s21 = smov 0   ;;  %s2542_s22 = smov 0  }
   0x5   :  { %s2544_s23 = smov 0   ;;  %s2546_s24 = smov 0  }
   0x6 LB: > { %s2561_s25 = sadd.s32 4294967295, %s2492_s24   ;;  %s2073_s26 = sadd.s32 4294967294, %s2492_s24   ;;  %s2492_s24 = sphi %s2546_s24, %s3313_s24   ;;  %s2488_s23 = sphi %s2544_s23, %s3312_s23   ;;  %s2484_s22 = sphi %s2542_s22, %s3311_s22   ;;  %s2480_s21 = sphi %s2540_s21, %s3310_s21  }
   0x7   : > { %p43_p0 = scmp.ne.s32.totalorder %s2484_s22, %s2480_s21  ;;  %p3295_p1 = scmp.eq.s32.totalorder %s2561_s25, 0 }
   0x8   : > { %p178_p3 = scmp.eq.s32.totalorder %s2073_s26, 3  ;;  %p2074_p5 = scmp.ge.s32.totalorder %s2492_s24, 1 }
   0x9   : > { %p2570_p4 = por %p3295_p1, %p43_p0  ;;  %p185_p7 = scmp.lt.s32.totalorder %s2492_s24, 5 }
   0xa   : > { %p2575_p6 = por %p178_p3, %p43_p0  ;;  %s2494_s30 = smov [#allocation5]  }
   0xb   : > { %s3298_s27 = scalar_select %p2570_p4, 1, 0 }
   0xc   : > { %s3299_s28 = scalar_select %p2575_p6, 1, 0 }
   0xd   : > { %p2580_p8 = pnand %p2074_p5, %p185_p7  ;;  %s197_s7 = sshll.u32 %s2494_s30, 4  ;;  %s198_s7 = int_to_ptr.vmem [resolvable:$true] %s197_s7 }
   0xe   : > { %s2495_s9 = smov [#allocation7]   ;;  %s2336_s13 = scalar_lea.hbm %s3289_s1, 2048 }
   0xf   : > { %s3300_s29 = scalar_select %p2580_p8, 1, 0 }
  0x10   : > { %p2202_p9 = pneg %p2580_p8  ;;  %s216_s10 = sshll.u32 %s2495_s9, 4  ;;  %s2592_s10 = int_to_ptr.vmem [resolvable:$true] %s216_s10 }
  0x11   : > { %p2337_p11 = scmp.ne.s32.totalorder %s3289_s1, %s2336_s13  ;;  %p2343_p3 = scmp.lt.u32.totalorder %s2336_s13, %s3289_s1 }
  0x12   : > { %p2588_p10 = pnand %p2202_p9, %p3295_p1 }
  0x14   : > { %p2338_p12 = pneg %p2588_p10 }
  0x16   : > { %p2339_p13 = pnand %p2338_p12, %p2337_p11 }
  0x18   : > { %p2340_p0 = pneg %p2339_p13 }
  0x1a   : > { %p2345_p5 = pnand %p2343_p3, %p2340_p0 }
  0x1c   : > { %2348 = shalt.err (!%p2345_p5)
}
  0x1d   : > { %s2349_s18 = scalar_lea.vmem %s198_s7, 2048  ;;  %p2357_p2 = scmp.lt.s32.totalorder %s198_s7, %s198_s7 }
  0x1e   : > { %p2350_p7 = scmp.ne.s32.totalorder %s198_s7, %s2349_s18  ;;  %p2358_p6 = scmp.lt.s32.totalorder %s2349_s18, %s2349_s18 }
  0x20   : > { %p2352_p9 = pnand %p2350_p7, %p2338_p12  ;;  %p2359_p4 = por %p2358_p6, %p2357_p2 }
  0x22   : > { %p2353_p1 = pneg %p2352_p9 }
  0x24   : > { %p2360_p8 = pnand %p2359_p4, %p2353_p1 }
  0x26   : > { %2363 = shalt.err (!%p2360_p8)
}
  0x27   : > { %s2496_s19 = smov 128   ;;  %s2497_s20 = smov 8  }
  0x28   : > { %2205 = dma.hbm_to_vmem [thread:$0]  (!%p2588_p10), %s3289_s1, 2048, %s198_s7, [#allocation6], %s2496_s19, %s2496_s19, %s2497_s20  }
  0x29   : > { %s2364_s12 = scalar_lea.hbm %s3292_s4, 2048 }
  0x2a   : > { %p2365_p11 = scmp.ne.s32.totalorder %s3292_s4, %s2364_s12  ;;  %p2371_p4 = scmp.lt.u32.totalorder %s2364_s12, %s3292_s4 }
  0x2c   : > { %p2367_p1 = pnand %p2365_p11, %p2338_p12 }
  0x2e   : > { %p2368_p2 = pneg %p2367_p1 }
  0x30   : > { %p2373_p6 = pnand %p2371_p4, %p2368_p2 }
  0x32   : > { %2376 = shalt.err (!%p2373_p6)
}
  0x33   : > { %s2377_s7 = scalar_lea.vmem %s2592_s10, 2048  ;;  %p2385_p3 = scmp.lt.s32.totalorder %s2592_s10, %s2592_s10 }
  0x34   : > { %p2378_p8 = scmp.ne.s32.totalorder %s2592_s10, %s2377_s7  ;;  %p2386_p5 = scmp.lt.s32.totalorder %s2377_s7, %s2377_s7 }
  0x36   : > { %p2380_p13 = pnand %p2378_p8, %p2338_p12  ;;  %p2387_p7 = por %p2386_p5, %p2385_p3 }
  0x38   : > { %p2381_p0 = pneg %p2380_p13 }
  0x3a   : > { %p2388_p9 = pnand %p2387_p7, %p2381_p0 }
  0x3c   : > { %2391 = shalt.err (!%p2388_p9)
}
  0x3d   : > { %s2498_s17 = smov 64   ;;  %s2499_s18 = smov 4  }
  0x3e   : > { %2208 = dma.hbm_to_vmem [thread:$0]  (!%p2588_p10), %s3292_s4, 2048, %s2592_s10, [#allocation6], %s2498_s17, %s2498_s17, %s2499_s18  }
  0x3f   : > { %s2645_s26 = sadd.s32 1, %s2492_s24   ;;  %s30_s9 = sadd.s32 1, %s2488_s23 }
  0x40   : > { %s27_s30 = ssub.s32 %s2492_s24, %s2645_s26  ;;  %p37_p11 = scmp.ne.s32.totalorder %s2488_s23, %s2484_s22 }
  0x41   : > { %p28_p12 = scmp.eq.s32.totalorder %s27_s30, 0  ;;  %p38_p1 = scmp.eq.s32.totalorder %s2492_s24, 0 }
  0x42   : > { %p3302_p4 = scmp.eq.s32.totalorder %s2561_s25, 3  ;;  %p2219_p8 = scmp.lt.s32.totalorder %s2492_s24, 4 }
  0x43   : > { %s2654_s11 = scalar_select %p28_p12, %s2488_s23, %s30_s9  }
  0x44   : > { %p39_p2 = por %p38_p1, %p37_p11  ;;  %p2658_p6 = por %p3302_p4, %p37_p11 }
  0x45   : > { %s233_s12 = sand.u32 1, %s2488_s23   ;;  %s2156_s10 = sshll.u32 %s2492_s24, 12 }
  0x46   : > { %s2078_s13 = sshll.u32 %s233_s12, 8  ;;  %s2668_s16 = scalar_lea.hbm %s3288_s0, %s2156_s10 }
  0x47   : > { %s237_s7 = scalar_lea.vmem [#allocation2], %s2078_s13  ;;  %p2672_p10 = pnand %p2219_p8, %p39_p2 }
  0x48   : > { %s244_s19 = sshll.u32 %s237_s7, 4  ;;  %s2676_s30 = scalar_lea.sflag [#allocation3], %s233_s12  ;;  %s2670_s19 = int_to_ptr.vmem [resolvable:$true] %s244_s19 }
  0x49   : > { %s2392_s9 = scalar_lea.hbm %s2668_s16, 4096  ;;  %p2394_p0 = pneg %p2672_p10 }
  0x4a   : > { %p2393_p13 = scmp.ne.s32.totalorder %s2668_s16, %s2392_s9  ;;  %s2397_s14 = scalar_lea.hbm %s3288_s0, 16384 }
  0x4b   : > { %p2398_p7 = scmp.lt.u32.totalorder %s2668_s16, %s3288_s0  ;;  %p2399_p9 = scmp.lt.u32.totalorder %s2397_s14, %s2392_s9 }
  0x4c   : > { %p2395_p3 = pnand %p2394_p0, %p2393_p13  ;;  %p2401_p11 = scmp.lt.u32.totalorder %s2392_s9, %s2668_s16 }
  0x4d   : > { %p2400_p12 = por %p2399_p9, %p2398_p7 }
  0x4e   : > { %p2396_p5 = pneg %p2395_p3 }
  0x4f   : > { %p2402_p1 = por %p2401_p11, %p2400_p12 }
  0x51   : > { %p2403_p2 = pnand %p2402_p1, %p2396_p5 }
  0x53   : > { %2406 = shalt.err (!%p2403_p2)
}
  0x54   : > { %s2407_s12 = scalar_lea.vmem %s2670_s19, 4096  ;;  %s2500_s13 = smov [#allocation2]  }
  0x55   : > { %p2408_p4 = scmp.ne.s32.totalorder %s2670_s19, %s2407_s12  ;;  %s2412_s10 = sshll.u32 %s2500_s13, 4  ;;  %s2413_s10 = int_to_ptr.vmem [resolvable:$false] %s2412_s10 }
  0x56   : > { %s2414_s15 = scalar_lea.vmem %s2413_s10, 8192  ;;  %p2415_p3 = scmp.lt.s32.totalorder %s2670_s19, %s2413_s10 }
  0x57   : > { %p2410_p8 = pnand %p2408_p4, %p2394_p0  ;;  %p2416_p7 = scmp.lt.s32.totalorder %s2414_s15, %s2407_s12 }
  0x59   : > { %p2411_p13 = pneg %p2410_p8  ;;  %p2417_p9 = por %p2416_p7, %p2415_p3 }
  0x5b   : > { %p2418_p12 = pnand %p2417_p9, %p2411_p13 }
  0x5d   : > { %2421 = shalt.err (!%p2418_p12)
}
  0x5e   : > { %2212 = dma.hbm_to_vmem [thread:$0]  (!%p2672_p10), %s2668_s16, 4096, %s2670_s19, %s2676_s30, %s2498_s17, %s2498_s17, %s2499_s18  }
  0x5f   : > { %p3305_p0 = scmp.ne.s32.totalorder %s3300_s29, 0 }
  0x60   : > { %s2710_s9 = sand.u32 (!%p3305_p0), 1, %s2484_s22   ;;  %p3306_p5 = scmp.ne.s32.totalorder (!%p3305_p0), %s3298_s27, 0 }
  0x61   : > { %256 = sbr.rel (%p3305_p0) target bundleno = 845 (0x34d), region = 44  ;;  %s2082_s14 = sshll.u32 (!%p3305_p0), %s2710_s9, 8 }
  0x62   : > { %s259_s7 = scalar_lea.sflag (!%p3305_p0), [#allocation3], %s2710_s9  ;;  %s2714_s12 = scalar_lea.vmem (!%p3305_p0), [#allocation2], %s2082_s14 }
  0x68   : > { %2467 = dma.done.wait (%p3306_p5), %s259_s7, 4096  }
  0x69   : > { %2469 = vsyncadd (%p3306_p5), %s259_s7, 4294963200  ;;  %p3307_p10 = scmp.eq.s32.totalorder %s2561_s25, 0 }
  0x6b   : > { %2471 = dma.done.wait (%p3307_p10), [#allocation6], 4096   ;;  %p3308_p11 = pmov %p3307_p10 }
  0x6c   : > { %v2501_v0 = vmov 0   ;;  %v2264_v1 = vld [vmem:[#allocation5 + $0x4] ss:$8 sps:$4 sm:$0xff]   ;;  %v2266_v2 = vld [vmem:[#allocation5] ss:$8 sps:$4 sm:$0xff]   ;;  %v2290_v19 = vld [vmem:[%s2714_s12 + $0x10] sm:$0xff]   ;;  %v1009_v59 = vlaneseq }
  0x6d   : > { %2473 = vsyncadd (%p3308_p11), [#allocation6], 4294963200  ;;  %686 = vmatprep.mubr.bf16.mxu0 %v2501_v0  ;;  %2158 = vmatprep.subr.bf16.mxu1 %v2501_v0  ;;  %v2267_v3 = vld [vmem:[#allocation5 + $0x14] ss:$8 sps:$4 sm:$0xff]   ;;  %v2269_v4 = vld [vmem:[#allocation5 + $0x10] ss:$8 sps:$4 sm:$0xff]  }
  0x6e   : > { %654 = vmatprep.subr.bf16.mxu0 %v2264_v1  ;;  %v2270_v5 = vld [vmem:[#allocation5 + $0x24] ss:$8 sps:$4 sm:$0xff]   ;;  %v2272_v6 = vld [vmem:[#allocation5 + $0x20] ss:$8 sps:$4 sm:$0xff]   ;;  %v2273_v7 = vld [vmem:[#allocation5 + $0x34] ss:$8 sps:$4 sm:$0xff]  }
  0x6f   : > { %655 = vmatpush1.bf16.msra.mxu0 %v2266_v2  ;;  %v2275_v8 = vld [vmem:[#allocation5 + $0x30] ss:$8 sps:$4 sm:$0xff]   ;;  %v2276_v9 = vld [vmem:[#allocation5 + $0x44] ss:$8 sps:$4 sm:$0xff]   ;;  %v2278_v10 = vld [vmem:[#allocation5 + $0x40] ss:$8 sps:$4 sm:$0xff]  }
  0x70   : > { %656 = vmatprep.subr.bf16.mxu0 %v2267_v3  ;;  %v2279_v11 = vld [vmem:[#allocation5 + $0x54] ss:$8 sps:$4 sm:$0xff]   ;;  %v2281_v12 = vld [vmem:[#allocation5 + $0x50] ss:$8 sps:$4 sm:$0xff]   ;;  %v2282_v13 = vld [vmem:[#allocation5 + $0x64] ss:$8 sps:$4 sm:$0xff]  }
  0x71   : > { %v2284_v14 = vld [vmem:[#allocation5 + $0x60] ss:$8 sps:$4 sm:$0xff]   ;;  %v2285_v15 = vld [vmem:[#allocation5 + $0x74] ss:$8 sps:$4 sm:$0xff]   ;;  %v2287_v16 = vld [vmem:[#allocation5 + $0x70] ss:$8 sps:$4 sm:$0xff]  }
  0x72   : > { %v2288_v17 = vld [vmem:[%s2714_s12] sm:$0xff]   ;;  %v2289_v18 = vld [vmem:[%s2714_s12 + $0x8] sm:$0xff]   ;;  %v2291_v20 = vld [vmem:[%s2714_s12 + $0x18] sm:$0xff]   ;;  %v1010_v60 = vshrl.u32 %v1009_v59, 7  ;;  %s2085_s16 = sshll.u32 %s2710_s9, 9  ;;  %s2157_s13 = sshll.u32 %s2561_s25, 13 }
  0x73   : > { %657 = vmatpush1.bf16.msra.mxu0 %v2269_v4  ;;  %v2292_v21 = vld [vmem:[%s2714_s12 + $0x20] sm:$0xff]   ;;  %v2293_v22 = vld [vmem:[%s2714_s12 + $0x28] sm:$0xff]   ;;  %v2294_v23 = vld [vmem:[%s2714_s12 + $0x30] sm:$0xff]   ;;  %s3096_s30 = scalar_lea.vmem [#allocation8], %s2085_s16  ;;  %s3240_s7 = scalar_lea.hbm %s3294_s6, %s2157_s13 }
  0x74   : > { %658 = vmatprep.subr.bf16.mxu0 %v2270_v5  ;;  %v2311_v24 = vld [vmem:[#allocation7] sm:$0xff]   ;;  %v2312_v25 = vld [vmem:[#allocation7 + $0x8] sm:$0xff]   ;;  %v2295_v26 = vld [vmem:[%s2714_s12 + $0x38] sm:$0xff]   ;;  %v1011_v62 = vsub.s32 0, %v1010_v60  ;;  %v1015_v1 = vsub.s32 1, %v1010_v60  ;;  %s1981_s10 = sshll.u32 %s3096_s30, 4  ;;  %s3242_s10 = int_to_ptr.vmem [resolvable:$true] %s1981_s10 }
  0x75   : > { %2174 = vmatpush1.bf16.msra.mxu1 %v2311_v24  ;;  %v2314_v27 = vld [vmem:[#allocation7 + $0x10] sm:$0xff]   ;;  %v2315_v28 = vld [vmem:[#allocation7 + $0x18] sm:$0xff]   ;;  %v2296_v29 = vld [vmem:[%s2714_s12 + $0x40] sm:$0xff]   ;;  %s1968_s25 = scalar_lea.sflag [#allocation4], %s2710_s9  ;;  %s2502_s27 = smov [#allocation8]  }
  0x76   : > { %2159 = vmatprep.subr.bf16.mxu1 %v2501_v0  ;;  %v2317_v30 = vld [vmem:[#allocation7 + $0x20] sm:$0xff]   ;;  %v2318_v31 = vld [vmem:[#allocation7 + $0x28] sm:$0xff]   ;;  %v2320_v33 = vld [vmem:[#allocation7 + $0x30] sm:$0xff]   ;;  %s2426_s29 = sshll.u32 %s2502_s27, 4  ;;  %s2427_s29 = int_to_ptr.vmem [resolvable:$false] %s2426_s29 }
  0x77   : > { %659 = vmatpush1.bf16.msra.mxu0 %v2272_v6  ;;  %v2297_v32 = vld [vmem:[%s2714_s12 + $0x48] sm:$0xff]   ;;  %v2321_v34 = vld [vmem:[#allocation7 + $0x38] sm:$0xff]   ;;  %v2298_v35 = vld [vmem:[%s2714_s12 + $0x50] sm:$0xff]   ;;  %s2428_s17 = scalar_lea.vmem %s2427_s29, 16384  ;;  %p2429_p8 = scmp.lt.s32.totalorder %s3242_s10, %s2427_s29 }
  0x78   : > { %660 = vmatprep.subr.bf16.mxu0 %v2273_v7  ;;  %v2323_v36 = vld [vmem:[#allocation7 + $0x40] sm:$0xff]   ;;  %v2324_v37 = vld [vmem:[#allocation7 + $0x48] sm:$0xff]   ;;  %v2299_v38 = vld [vmem:[%s2714_s12 + $0x58] sm:$0xff]  }
  0x79   : > { %2175 = vmatpush1.bf16.msra.mxu1 %v2312_v25  ;;  %v2326_v39 = vld [vmem:[#allocation7 + $0x50] sm:$0xff]   ;;  %v2327_v40 = vld [vmem:[#allocation7 + $0x58] sm:$0xff]   ;;  %v2300_v41 = vld [vmem:[%s2714_s12 + $0x60] sm:$0xff]  }
  0x7a   : > { %2160 = vmatprep.subr.bf16.mxu1 %v2501_v0  ;;  %v2329_v42 = vld [vmem:[#allocation7 + $0x60] sm:$0xff]   ;;  %v2330_v43 = vld [vmem:[#allocation7 + $0x68] sm:$0xff]   ;;  %v2332_v45 = vld [vmem:[#allocation7 + $0x70] sm:$0xff]  }
  0x7b   : > { %661 = vmatpush1.bf16.msra.mxu0 %v2275_v8  ;;  %v2301_v44 = vld [vmem:[%s2714_s12 + $0x68] sm:$0xff]   ;;  %v2333_v46 = vld [vmem:[#allocation7 + $0x78] sm:$0xff]   ;;  %v2302_v47 = vld [vmem:[%s2714_s12 + $0x70] sm:$0xff]  }
  0x7c   : > { %662 = vmatprep.subr.bf16.mxu0 %v2276_v9  ;;  %v2303_v48 = vld [vmem:[%s2714_s12 + $0x78] sm:$0xff]   ;;  %v2304_v49 = vld [vmem:[%s2714_s12 + $0x80] sm:$0xff]   ;;  %v2305_v50 = vld [vmem:[%s2714_s12 + $0x88] sm:$0xff]  }
  0x7d   : > { %2176 = vmatpush1.bf16.msra.mxu1 %v2314_v27  ;;  %v2306_v51 = vld [vmem:[%s2714_s12 + $0x90] sm:$0xff]   ;;  %v2307_v52 = vld [vmem:[%s2714_s12 + $0x98] sm:$0xff]   ;;  %v2308_v53 = vld [vmem:[%s2714_s12 + $0xa0] sm:$0xff]  }
  0x7e   : > { %2161 = vmatprep.subr.bf16.mxu1 %v2501_v0  ;;  %v2309_v54 = vld [vmem:[%s2714_s12 + $0xa8] sm:$0xff]   ;;  %v2310_v55 = vld [vmem:[%s2714_s12 + $0xb0] sm:$0xff]   ;;  %v2313_v56 = vld [vmem:[%s2714_s12 + $0xb8] sm:$0xff]  }
  0x7f   : > { %663 = vmatpush1.bf16.msra.mxu0 %v2278_v10  ;;  %v2316_v57 = vld [vmem:[%s2714_s12 + $0xc0] sm:$0xff]   ;;  %v2319_v58 = vld [vmem:[%s2714_s12 + $0xc8] sm:$0xff]   ;;  %v2322_v61 = vld [vmem:[%s2714_s12 + $0xd0] sm:$0xff]  }
  0x80   : > { %664 = vmatprep.subr.bf16.mxu0 %v2279_v11  ;;  %v1007_v63 = vld [vmem:[%s3290_s2] sm:$0x3]  ;;  %v2325_v10 = vld [vmem:[%s2714_s12 + $0xd8] sm:$0xff]  }
  0x81   : > { %2177 = vmatpush1.bf16.msra.mxu1 %v2315_v28  ;;  %v1147_v2 = vld [vmem:[%s3291_s3] sm:$0x3]  ;;  %v2816_v3 = vrot.slane %v1007_v63, %v1011_v62  ;;  %v2818_v4 = vrot.slane %v1007_v63, %v1015_v1 }
  0x82   : > { %2162 = vmatprep.subr.bf16.mxu1 %v2501_v0  ;;  %v2821_v5 = vrot.slane %v1147_v2, %v1011_v62  ;;  %v2823_v7 = vrot.slane %v1147_v2, %v1015_v1  ;;  %v2334_v2 = vld [vmem:[%s2714_s12 + $0xf0] sm:$0xff]  }
  0x83   : > { %665 = vmatpush1.bf16.msra.mxu0 %v2281_v12 }
  0x84   : > { %666 = vmatprep.subr.bf16.mxu0 %v2282_v13 }
  0x85   : > { %2178 = vmatpush1.bf16.msra.mxu1 %v2317_v30 }
  0x86   : > { %2163 = vmatprep.subr.bf16.mxu1 %v2501_v0 }
  0x87   : > { %667 = vmatpush1.bf16.msra.mxu0 %v2284_v14 }
  0x88   : > { %668 = vmatprep.subr.bf16.mxu0 %v2285_v15 }
  0x89   : > { %2179 = vmatpush1.bf16.msra.mxu1 %v2318_v31 }
  0x8a   : > { %2164 = vmatprep.subr.bf16.mxu1 %v2501_v0 }
  0x8b   : > { %669 = vmatpush1.bf16.msra.mxu0 %v2287_v16 }
  0x8c   : > { %1614 = vmatprep.subr.bf16.mxu0 %v2501_v0 }
  0x8d   : > { %2180 = vmatpush1.bf16.msra.mxu1 %v2320_v33 }
  0x8e   : > { %687 = vmatmul.mubr.bf16.vlgmr.msra.gmra.mrb[0].mxu0 %v2288_v17  ;;  %2165 = vmatprep.subr.bf16.mxu1 %v2501_v0 }
  0x8f   : > { %696 = vmatprep.mubr.bf16.mxu0 %v2501_v0  ;;  %1615 = vmatpush1.bf16.msra.mxu0 %v2311_v24 }
  0x90   : > { %1616 = vmatprep.subr.bf16.mxu0 %v2501_v0 }
  0x91   : > { %2181 = vmatpush1.bf16.msra.mxu1 %v2321_v34 }
  0x92   : > { %2166 = vmatprep.subr.bf16.mxu1 %v2501_v0 }
  0x93   : > { %1617 = vmatpush1.bf16.msra.mxu0 %v2312_v25 }
  0x94   : > { %1618 = vmatprep.subr.bf16.mxu0 %v2501_v0 }
  0x95   : > { %2182 = vmatpush1.bf16.msra.mxu1 %v2323_v36 }
  0x96   : > { %697 = vmatmul.mubr.bf16.gmra.mrb[4].mxu0 %v2289_v18  ;;  %2167 = vmatprep.subr.bf16.mxu1 %v2501_v0 }
  0x97   : > { %706 = vmatprep.mubr.bf16.mxu0 %v2501_v0  ;;  %1619 = vmatpush1.bf16.msra.mxu0 %v2314_v27 }
  0x98   : > { %1620 = vmatprep.subr.bf16.mxu0 %v2501_v0 }
  0x99   : > { %2183 = vmatpush1.bf16.msra.mxu1 %v2324_v37 }
  0x9a   : > { %2168 = vmatprep.subr.bf16.mxu1 %v2501_v0 }
  0x9b   : > { %1621 = vmatpush1.bf16.msra.mxu0 %v2315_v28  ;;  %v2328_v28 = vld [vmem:[%s2714_s12 + $0xe0] sm:$0xff]  }
  0x9c   : > { %1622 = vmatprep.subr.bf16.mxu0 %v2501_v0 }
  0x9d   : > { %2184 = vmatpush1.bf16.msra.mxu1 %v2326_v39 }
  0x9e   : > { %707 = vmatmul.mubr.bf16.gmra.mrb[8].mxu0 %v2290_v19  ;;  %2169 = vmatprep.subr.bf16.mxu1 %v2501_v0 }
  0x9f   : > { %716 = vmatprep.mubr.bf16.mxu0 %v2501_v0  ;;  %1623 = vmatpush1.bf16.msra.mxu0 %v2317_v30 }
  0xa0   : > { %1624 = vmatprep.subr.bf16.mxu0 %v2501_v0 }
  0xa1   : > { %2185 = vmatpush1.bf16.msra.mxu1 %v2327_v40 }
  0xa2   : > { %2170 = vmatprep.subr.bf16.mxu1 %v2501_v0 }
  0xa3   : > { %1625 = vmatpush1.bf16.msra.mxu0 %v2318_v31 }
  0xa4   : > { %1626 = vmatprep.subr.bf16.mxu0 %v2501_v0 }
  0xa5   : > { %2186 = vmatpush1.bf16.msra.mxu1 %v2329_v42 }
  0xa6   : > { %717 = vmatmul.mubr.bf16.gmra.mrb[12].mxu0 %v2291_v20  ;;  %2171 = vmatprep.subr.bf16.mxu1 %v2501_v0 }
  0xa7   : > { %726 = vmatprep.mubr.bf16.mxu0 %v2501_v0  ;;  %1627 = vmatpush1.bf16.msra.mxu0 %v2320_v33 }
  0xa8   : > { %1628 = vmatprep.subr.bf16.mxu0 %v2501_v0 }
  0xa9   : > { %2187 = vmatpush1.bf16.msra.mxu1 %v2330_v43 }
  0xaa   : > { %2172 = vmatprep.subr.bf16.mxu1 %v2501_v0 }
  0xab   : > { %1629 = vmatpush1.bf16.msra.mxu0 %v2321_v34 }
  0xac   : > { %1630 = vmatprep.subr.bf16.mxu0 %v2501_v0 }
  0xad   : > { %2188 = vmatpush1.bf16.msra.mxu1 %v2332_v45 }
  0xae   : > { %727 = vmatmul.mubr.bf16.gmra.mrb[16].mxu0 %v2292_v21  ;;  %2173 = vmatprep.subr.bf16.mxu1 %v2501_v0 }
  0xaf   : > { %736 = vmatprep.mubr.bf16.mxu0 %v2501_v0  ;;  %1631 = vmatpush1.bf16.msra.mxu0 %v2323_v36 }
  0xb0   : > { %1632 = vmatprep.subr.bf16.mxu0 %v2501_v0 }
  0xb1   : > { %2189 = vmatpush1.bf16.msra.mxu1 %v2333_v46 }
  0xb3   : > { %1633 = vmatpush1.bf16.msra.mxu0 %v2324_v37 }
  0xb4   : > { %1634 = vmatprep.subr.bf16.mxu0 %v2501_v0 }
  0xb6   : > { %737 = vmatmul.mubr.bf16.gmra.mrb[20].mxu0 %v2293_v22 }
  0xb7   : > { %746 = vmatprep.mubr.bf16.mxu0 %v2501_v0  ;;  %1635 = vmatpush1.bf16.msra.mxu0 %v2326_v39 }
  0xb8   : > { %1636 = vmatprep.subr.bf16.mxu0 %v2501_v0 }
  0xbb   : > { %1637 = vmatpush1.bf16.msra.mxu0 %v2327_v40 }
  0xbc   : > { %1638 = vmatprep.subr.bf16.mxu0 %v2501_v0 }
  0xbe   : > { %747 = vmatmul.mubr.bf16.gmra.mrb[24].mxu0 %v2294_v23 }
  0xbf   : > { %756 = vmatprep.mubr.bf16.mxu0 %v2501_v0  ;;  %1639 = vmatpush1.bf16.msra.mxu0 %v2329_v42 }
  0xc0   : > { %1640 = vmatprep.subr.bf16.mxu0 %v2501_v0 }
  0xc3   : > { %1641 = vmatpush1.bf16.msra.mxu0 %v2330_v43 }
  0xc4   : > { %1642 = vmatprep.subr.bf16.mxu0 %v2501_v0 }
  0xc6   : > { %757 = vmatmul.mubr.bf16.gmra.mrb[28].mxu0 %v2295_v26 }
  0xc7   : > { %766 = vmatprep.mubr.bf16.mxu0 %v2501_v0  ;;  %1643 = vmatpush1.bf16.msra.mxu0 %v2332_v45 }
  0xc8   : > { %1644 = vmatprep.subr.bf16.mxu0 %v2501_v0 }
  0xcb   : > { %1645 = vmatpush1.bf16.msra.mxu0 %v2333_v46  ;;  %v2331_v46 = vld [vmem:[%s2714_s12 + $0xe8] sm:$0xff]  }
  0xce   : > { %767 = vmatmul.mubr.bf16.gmra.mrb[32].mxu0 %v2296_v29 }
  0xcf   : > { %776 = vmatprep.mubr.bf16.mxu0 %v2501_v0 }
  0xd6   : > { %777 = vmatmul.mubr.bf16.gmra.mrb[36].mxu0 %v2297_v32 }
  0xd7   : > { %786 = vmatprep.mubr.bf16.mxu0 %v2501_v0 }
  0xde   : > { %787 = vmatmul.mubr.bf16.gmra.mrb[40].mxu0 %v2298_v35 }
  0xdf   : > { %796 = vmatprep.mubr.bf16.mxu0 %v2501_v0 }
  0xe6   : > { %797 = vmatmul.mubr.bf16.gmra.mrb[44].mxu0 %v2299_v38 }
  0xe7   : > { %806 = vmatprep.mubr.bf16.mxu0 %v2501_v0 }
  0xee   : > { %807 = vmatmul.mubr.bf16.gmra.mrb[48].mxu0 %v2300_v41 }
  0xef   : > { %816 = vmatprep.mubr.bf16.mxu0 %v2501_v0 }
  0xf6   : > { %817 = vmatmul.mubr.bf16.gmra.mrb[52].mxu0 %v2301_v44 }
  0xf7   : > { %826 = vmatprep.mubr.bf16.mxu0 %v2501_v0 }
  0xfe   : > { %827 = vmatmul.mubr.bf16.gmra.mrb[56].mxu0 %v2302_v47 }
  0xff   : > { %836 = vmatprep.mubr.bf16.mxu0 %v2501_v0 }
 0x106   : > { %837 = vmatmul.mubr.bf16.gmra.mrb[60].mxu0 %v2303_v48 }
 0x107   : > { %846 = vmatprep.mubr.bf16.mxu0 %v2501_v0 }
 0x10e   : > { %847 = vmatmul.mubr.bf16.gmra.mrb[64].mxu0 %v2304_v49 }
 0x10f   : > { %856 = vmatprep.mubr.bf16.mxu0 %v2501_v0 }
 0x116   : > { %857 = vmatmul.mubr.bf16.gmra.mrb[68].mxu0 %v2305_v50 }
 0x117   : > { %866 = vmatprep.mubr.bf16.mxu0 %v2501_v0 }
 0x11e   : > { %867 = vmatmul.mubr.bf16.gmra.mrb[72].mxu0 %v2306_v51 }
 0x11f   : > { %876 = vmatprep.mubr.bf16.mxu0 %v2501_v0 }
 0x126   : > { %877 = vmatmul.mubr.bf16.gmra.mrb[76].mxu0 %v2307_v52 }
 0x127   : > { %886 = vmatprep.mubr.bf16.mxu0 %v2501_v0 }
 0x12e   : > { %887 = vmatmul.mubr.bf16.gmra.mrb[80].mxu0 %v2308_v53 }
 0x12f   : > { %896 = vmatprep.mubr.bf16.mxu0 %v2501_v0 }
 0x136   : > { %897 = vmatmul.mubr.bf16.gmra.mrb[84].mxu0 %v2309_v54 }
 0x137   : > { %906 = vmatprep.mubr.bf16.mxu0 %v2501_v0 }
 0x13e   : > { %907 = vmatmul.mubr.bf16.gmra.mrb[88].mxu0 %v2310_v55 }
 0x13f   : > { %916 = vmatprep.mubr.bf16.mxu0 %v2501_v0 }
 0x146   : > { %917 = vmatmul.mubr.bf16.gmra.mrb[92].mxu0 %v2313_v56 }
 0x147   : > { %926 = vmatprep.mubr.bf16.mxu0 %v2501_v0 }
 0x14e   : > { %927 = vmatmul.mubr.bf16.gmra.mrb[96].mxu0 %v2316_v57 }
 0x14f   : > { %936 = vmatprep.mubr.bf16.mxu0 %v2501_v0 }
 0x156   : > { %937 = vmatmul.mubr.bf16.gmra.mrb[100].mxu0 %v2319_v58 }
 0x157   : > { %946 = vmatprep.mubr.bf16.mxu0 %v2501_v0 }
 0x15e   : > { %947 = vmatmul.mubr.bf16.gmra.mrb[104].mxu0 %v2322_v61 }
 0x15f   : > { %956 = vmatprep.mubr.bf16.mxu0 %v2501_v0 }
 0x161   : > { %v688_v6 = vpop.f32.mrb[0].mxu0 }
 0x162   : > { %v1019_v8 = vmul.f32 %v2816_v3, %v688_v6  ;;  %v690_v9 = vpop.f32.mrb[1].mxu0 }
 0x163   : > { %v1020_v11 = vmul.f32 %v2818_v4, %v690_v9  ;;  %v692_v12 = vpop.f32.mrb[2].mxu0 }
 0x164   : > { %v1159_v13 = vadd.f32 %v2821_v5, %v1019_v8  ;;  %v1021_v14 = vmul.f32 %v2816_v3, %v692_v12  ;;  %v694_v15 = vpop.f32.mrb[3].mxu0 }
 0x165   : > { %v1160_v16 = vadd.f32 %v2823_v7, %v1020_v11  ;;  %v1022_v17 = vmul.f32 %v2818_v4, %v694_v15 }
 0x166   : > { %v1161_v18 = vadd.f32 %v2821_v5, %v1021_v14  ;;  %957 = vmatmul.mubr.bf16.gmra.mrb[108].mxu0 %v2325_v10  ;;  %v1287_v20 = vmax.f32 %v1159_v13, 0.0 }
 0x167   : > { %v1162_v19 = vadd.f32 %v2823_v7, %v1022_v17  ;;  %966 = vmatprep.mubr.bf16.mxu0 %v2501_v0  ;;  %v1288_v22 = vmax.f32 %v1160_v16, 0.0 }
 0x168   : > { %v1289_v21 = vmax.f32 %v1161_v18, 0.0 }
 0x169   : > { %v1290_v23 = vmax.f32 %v1162_v19, 0.0  ;;  %v698_v24 = vpop.f32.mrb[4].mxu0 }
 0x16a   : > { %v2835_v25 = vpack.c.bf16 %v1289_v21, %v1287_v20  ;;  %v1023_v26 = vmul.f32 %v2816_v3, %v698_v24  ;;  %v700_v27 = vpop.f32.mrb[5].mxu0 }
 0x16b   : > { %v1024_v29 = vmul.f32 %v2818_v4, %v700_v27  ;;  %v702_v30 = vpop.f32.mrb[6].mxu0  ;;  %v2840_v31 = vpack.c.bf16 %v1290_v23, %v1288_v22 }
 0x16c   : > { %v1163_v32 = vadd.f32 %v2821_v5, %v1023_v26  ;;  %v1025_v33 = vmul.f32 %v2816_v3, %v702_v30  ;;  %v704_v34 = vpop.f32.mrb[7].mxu0  ;;  %v2335_v26 = vld [vmem:[%s2714_s12 + $0xf8] sm:$0xff]   ;;  %s2422_s12 = scalar_lea.vmem %s3242_s10, 8192 }
 0x16d   : > { %v1164_v35 = vadd.f32 %v2823_v7, %v1024_v29  ;;  %v1026_v36 = vmul.f32 %v2818_v4, %v704_v34  ;;  %p2423_p1 = scmp.ne.s32.totalorder %s3242_s10, %s2422_s12  ;;  %p2430_p13 = scmp.lt.s32.totalorder %s2428_s17, %s2422_s12 }
 0x16e   : > { %v1165_v37 = vadd.f32 %v2821_v5, %v1025_v33  ;;  %967 = vmatmul.mubr.bf16.gmra.mrb[112].mxu0 %v2328_v28  ;;  %v1291_v39 = vmax.f32 %v1163_v32, 0.0 }
 0x16f   : > { %v1166_v38 = vadd.f32 %v2823_v7, %v1026_v36  ;;  %976 = vmatprep.mubr.bf16.mxu0 %v2501_v0  ;;  %v1292_v41 = vmax.f32 %v1164_v35, 0.0  ;;  %p2424_p2 = pnand %p2423_p1, %p2658_p6  ;;  %p2431_p3 = por %p2430_p13, %p2429_p8 }
 0x170   : > { %v1293_v40 = vmax.f32 %v1165_v37, 0.0 }
 0x171   : > { %v1294_v42 = vmax.f32 %v1166_v38, 0.0  ;;  %v708_v43 = vpop.f32.mrb[8].mxu0  ;;  %p2425_p4 = pneg %p2424_p2 }
 0x172   : > { %v1027_v44 = vmul.f32 %v2816_v3, %v708_v43  ;;  %v710_v45 = vpop.f32.mrb[9].mxu0  ;;  %v2851_v47 = vpack.c.bf16 %v1293_v40, %v1291_v39 }
 0x173   : > { %v1028_v48 = vmul.f32 %v2818_v4, %v710_v45  ;;  %v712_v49 = vpop.f32.mrb[10].mxu0  ;;  %v2854_v50 = vpack.c.bf16 %v1294_v42, %v1292_v41  ;;  %p2432_p7 = pnand %p2431_p3, %p2425_p4 }
 0x174   : > { %v1167_v51 = vadd.f32 %v2821_v5, %v1027_v44  ;;  %v1029_v52 = vmul.f32 %v2816_v3, %v712_v49  ;;  %v714_v53 = vpop.f32.mrb[11].mxu0 }
 0x175   : > { %v1030_v54 = vmul.f32 %v2818_v4, %v714_v53  ;;  %v1168_v55 = vadd.f32 %v2823_v7, %v1028_v48 }
 0x176   : > { %v1169_v56 = vadd.f32 %v2821_v5, %v1029_v52  ;;  %977 = vmatmul.mubr.bf16.gmra.mrb[116].mxu0 %v2331_v46  ;;  %v1295_v58 = vmax.f32 %v1167_v51, 0.0 }
 0x177   : > { %986 = vmatprep.mubr.bf16.mxu0 %v2501_v0  ;;  %v1170_v57 = vadd.f32 %v2823_v7, %v1030_v54  ;;  %v1296_v61 = vmax.f32 %v1168_v55, 0.0 }
 0x178   : > { %v1297_v59 = vmax.f32 %v1169_v56, 0.0 }
 0x179   : > { %v718_v60 = vpop.f32.mrb[12].mxu0  ;;  %v1298_v62 = vmax.f32 %v1170_v57, 0.0 }
 0x17a   : > { %v1031_v63 = vmul.f32 %v2816_v3, %v718_v60  ;;  %v720_v1 = vpop.f32.mrb[13].mxu0  ;;  %v1419_v6 = vpack.c.bf16 %v1297_v59, %v1295_v58 }
 0x17b   : > { %v1032_v8 = vmul.f32 %v2818_v4, %v720_v1  ;;  %v722_v9 = vpop.f32.mrb[14].mxu0  ;;  %v1420_v10 = vpack.c.bf16 %v1298_v62, %v1296_v61 }
 0x17c   : > { %v1171_v11 = vadd.f32 %v2821_v5, %v1031_v63  ;;  %v1033_v12 = vmul.f32 %v2816_v3, %v722_v9  ;;  %v724_v13 = vpop.f32.mrb[15].mxu0 }
 0x17d   : > { %v1172_v14 = vadd.f32 %v2823_v7, %v1032_v8  ;;  %v1034_v15 = vmul.f32 %v2818_v4, %v724_v13  ;;  %1662 = vmatprep.mubr.bf16.mxu1 %v1420_v10 }
 0x17e   : > { %v1173_v16 = vadd.f32 %v2821_v5, %v1033_v12  ;;  %987 = vmatmul.mubr.bf16.gmra.mrb[120].mxu0 %v2334_v2  ;;  %1663 = vmatmul.mubr.bf16.vlgmr.msra.gmra.mrb[0].mxu1 %v1419_v6  ;;  %v1299_v18 = vmax.f32 %v1171_v11, 0.0 }
 0x17f   : > { %v1174_v17 = vadd.f32 %v2823_v7, %v1034_v15  ;;  %996 = vmatprep.mubr.bf16.mxu0 %v2501_v0  ;;  %v1300_v20 = vmax.f32 %v1172_v14, 0.0 }
 0x180   : > { %v1301_v19 = vmax.f32 %v1173_v16, 0.0 }
 0x181   : > { %v1302_v21 = vmax.f32 %v1174_v17, 0.0  ;;  %v728_v22 = vpop.f32.mrb[16].mxu0 }
 0x182   : > { %v1035_v23 = vmul.f32 %v2816_v3, %v728_v22  ;;  %v730_v24 = vpop.f32.mrb[17].mxu0  ;;  %v1421_v27 = vpack.c.bf16 %v1301_v19, %v1299_v18 }
 0x183   : > { %v1036_v28 = vmul.f32 %v2818_v4, %v730_v24  ;;  %v732_v29 = vpop.f32.mrb[18].mxu0  ;;  %v1422_v30 = vpack.c.bf16 %v1302_v21, %v1300_v20 }
 0x184   : > { %v1175_v32 = vadd.f32 %v2821_v5, %v1035_v23  ;;  %v1037_v33 = vmul.f32 %v2816_v3, %v732_v29  ;;  %v734_v34 = vpop.f32.mrb[19].mxu0 }
 0x185   : > { %v1176_v0 = vadd.f32 %v2823_v7, %v1036_v28  ;;  %v1038_v35 = vmul.f32 %v2818_v4, %v734_v34  ;;  %1670 = vmatprep.mubr.bf16.mxu1 %v1422_v30 }
 0x186   : > { %v1177_v36 = vadd.f32 %v2821_v5, %v1037_v33  ;;  %997 = vmatmul.mubr.bf16.gmra.mrb[124].mxu0 %v2335_v26  ;;  %1671 = vmatmul.mubr.bf16.gmra.mrb[4].mxu1 %v1421_v27  ;;  %v1303_v38 = vmax.f32 %v1175_v32, 0.0 }
 0x187   : > { %v1178_v37 = vadd.f32 %v2823_v7, %v1038_v35  ;;  %1646 = vmatprep.mubr.bf16.mxu0 %v2840_v31  ;;  %v1304_v40 = vmax.f32 %v1176_v0, 0.0 }
 0x188   : > { %v1305_v39 = vmax.f32 %v1177_v36, 0.0 }
 0x189   : > { %v1306_v41 = vmax.f32 %v1178_v37, 0.0  ;;  %v738_v42 = vpop.f32.mrb[20].mxu0 }
 0x18a   : > { %v1039_v43 = vmul.f32 %v2816_v3, %v738_v42  ;;  %v740_v44 = vpop.f32.mrb[21].mxu0  ;;  %v1423_v45 = vpack.c.bf16 %v1305_v39, %v1303_v38 }
 0x18b   : > { %v1040_v46 = vmul.f32 %v2818_v4, %v740_v44  ;;  %v742_v48 = vpop.f32.mrb[22].mxu0  ;;  %v1424_v49 = vpack.c.bf16 %v1306_v41, %v1304_v40 }
 0x18c   : > { %v1179_v51 = vadd.f32 %v2821_v5, %v1039_v43  ;;  %v1041_v52 = vmul.f32 %v2816_v3, %v742_v48  ;;  %v744_v53 = vpop.f32.mrb[23].mxu0 }
 0x18d   : > { %v1180_v31 = vadd.f32 %v2823_v7, %v1040_v46  ;;  %v1042_v54 = vmul.f32 %v2818_v4, %v744_v53  ;;  %1678 = vmatprep.mubr.bf16.mxu1 %v1424_v49 }
 0x18e   : > { %v1181_v55 = vadd.f32 %v2821_v5, %v1041_v52  ;;  %1647 = vmatmul.mubr.bf16.vlgmr.msra.gmra.mrb[128].mxu0 %v2835_v25  ;;  %1679 = vmatmul.mubr.bf16.gmra.mrb[8].mxu1 %v1423_v45  ;;  %v1307_v57 = vmax.f32 %v1179_v51, 0.0 }
 0x18f   : > { %v1182_v56 = vadd.f32 %v2823_v7, %v1042_v54  ;;  %1654 = vmatprep.mubr.bf16.mxu0 %v2854_v50  ;;  %v1308_v59 = vmax.f32 %v1180_v31, 0.0 }
 0x190   : > { %v1309_v58 = vmax.f32 %v1181_v55, 0.0 }
 0x191   : > { %v1310_v60 = vmax.f32 %v1182_v56, 0.0  ;;  %v748_v61 = vpop.f32.mrb[24].mxu0 }
 0x192   : > { %v1043_v62 = vmul.f32 %v2816_v3, %v748_v61  ;;  %v750_v63 = vpop.f32.mrb[25].mxu0  ;;  %v1425_v1 = vpack.c.bf16 %v1309_v58, %v1307_v57 }
 0x193   : > { %v1044_v2 = vmul.f32 %v2818_v4, %v750_v63  ;;  %v752_v6 = vpop.f32.mrb[26].mxu0  ;;  %v1426_v8 = vpack.c.bf16 %v1310_v60, %v1308_v59 }
 0x194   : > { %v1183_v25 = vadd.f32 %v2821_v5, %v1043_v62  ;;  %v1045_v9 = vmul.f32 %v2816_v3, %v752_v6  ;;  %v754_v10 = vpop.f32.mrb[27].mxu0 }
 0x195   : > { %v1184_v50 = vadd.f32 %v2823_v7, %v1044_v2  ;;  %v1046_v11 = vmul.f32 %v2818_v4, %v754_v10  ;;  %1686 = vmatprep.mubr.bf16.mxu1 %v1426_v8 }
 0x196   : > { %v1185_v12 = vadd.f32 %v2821_v5, %v1045_v9  ;;  %1655 = vmatmul.mubr.bf16.gmra.mrb[132].mxu0 %v2851_v47  ;;  %1687 = vmatmul.mubr.bf16.gmra.mrb[12].mxu1 %v1425_v1  ;;  %v1311_v14 = vmax.f32 %v1183_v25, 0.0 }
 0x197   : > { %v1186_v13 = vadd.f32 %v2823_v7, %v1046_v11  ;;  %v1312_v16 = vmax.f32 %v1184_v50, 0.0 }
 0x198   : > { %v1313_v15 = vmax.f32 %v1185_v12, 0.0 }
 0x199   : > { %v1314_v17 = vmax.f32 %v1186_v13, 0.0  ;;  %v758_v18 = vpop.f32.mrb[28].mxu0 }
 0x19a   : > { %v1047_v19 = vmul.f32 %v2816_v3, %v758_v18  ;;  %v760_v20 = vpop.f32.mrb[29].mxu0  ;;  %v1427_v21 = vpack.c.bf16 %v1313_v15, %v1311_v14 }
 0x19b   : > { %v1048_v22 = vmul.f32 %v2818_v4, %v760_v20  ;;  %v762_v23 = vpop.f32.mrb[30].mxu0  ;;  %v1428_v24 = vpack.c.bf16 %v1314_v17, %v1312_v16 }
 0x19c   : > { %v1187_v26 = vadd.f32 %v2821_v5, %v1047_v19  ;;  %v1049_v47 = vmul.f32 %v2816_v3, %v762_v23  ;;  %v764_v27 = vpop.f32.mrb[31].mxu0 }
 0x19d   : > { %v1188_v28 = vadd.f32 %v2823_v7, %v1048_v22  ;;  %v1050_v29 = vmul.f32 %v2818_v4, %v764_v27  ;;  %1694 = vmatprep.mubr.bf16.mxu1 %v1428_v24 }
 0x19e   : > { %v1189_v30 = vadd.f32 %v2821_v5, %v1049_v47  ;;  %1695 = vmatmul.mubr.bf16.gmra.mrb[16].mxu1 %v1427_v21  ;;  %v1315_v33 = vmax.f32 %v1187_v26, 0.0 }
 0x19f   : > { %v1190_v32 = vadd.f32 %v2823_v7, %v1050_v29  ;;  %v1316_v0 = vmax.f32 %v1188_v28, 0.0 }
 0x1a0   : > { %v1317_v34 = vmax.f32 %v1189_v30, 0.0 }
 0x1a1   : > { %v1318_v35 = vmax.f32 %v1190_v32, 0.0  ;;  %v768_v36 = vpop.f32.mrb[32].mxu0 }
 0x1a2   : > { %v1051_v37 = vmul.f32 %v2816_v3, %v768_v36  ;;  %v770_v38 = vpop.f32.mrb[33].mxu0  ;;  %v1429_v39 = vpack.c.bf16 %v1317_v34, %v1315_v33 }
 0x1a3   : > { %v1052_v40 = vmul.f32 %v2818_v4, %v770_v38  ;;  %v772_v41 = vpop.f32.mrb[34].mxu0  ;;  %v1430_v42 = vpack.c.bf16 %v1318_v35, %v1316_v0 }
 0x1a4   : > { %v1191_v43 = vadd.f32 %v2821_v5, %v1051_v37  ;;  %v1053_v44 = vmul.f32 %v2816_v3, %v772_v41  ;;  %v774_v45 = vpop.f32.mrb[35].mxu0 }
 0x1a5   : > { %v1192_v46 = vadd.f32 %v2823_v7, %v1052_v40  ;;  %v1054_v48 = vmul.f32 %v2818_v4, %v774_v45  ;;  %1702 = vmatprep.mubr.bf16.mxu1 %v1430_v42 }
 0x1a6   : > { %v1193_v49 = vadd.f32 %v2821_v5, %v1053_v44  ;;  %1703 = vmatmul.mubr.bf16.gmra.mrb[20].mxu1 %v1429_v39  ;;  %v1319_v52 = vmax.f32 %v1191_v43, 0.0 }
 0x1a7   : > { %v1194_v51 = vadd.f32 %v2823_v7, %v1054_v48  ;;  %v1320_v31 = vmax.f32 %v1192_v46, 0.0 }
 0x1a8   : > { %v1321_v53 = vmax.f32 %v1193_v49, 0.0 }
 0x1a9   : > { %v1322_v54 = vmax.f32 %v1194_v51, 0.0  ;;  %v778_v55 = vpop.f32.mrb[36].mxu0 }
 0x1aa   : > { %v1055_v56 = vmul.f32 %v2816_v3, %v778_v55  ;;  %v780_v57 = vpop.f32.mrb[37].mxu0  ;;  %v1431_v58 = vpack.c.bf16 %v1321_v53, %v1319_v52 }
 0x1ab   : > { %v1056_v59 = vmul.f32 %v2818_v4, %v780_v57  ;;  %v782_v60 = vpop.f32.mrb[38].mxu0  ;;  %v1432_v61 = vpack.c.bf16 %v1322_v54, %v1320_v31 }
 0x1ac   : > { %v1195_v62 = vadd.f32 %v2821_v5, %v1055_v56  ;;  %v1057_v63 = vmul.f32 %v2816_v3, %v782_v60  ;;  %v784_v1 = vpop.f32.mrb[39].mxu0 }
 0x1ad   : > { %v1196_v2 = vadd.f32 %v2823_v7, %v1056_v59  ;;  %v1058_v6 = vmul.f32 %v2818_v4, %v784_v1  ;;  %1710 = vmatprep.mubr.bf16.mxu1 %v1432_v61 }
 0x1ae   : > { %v1197_v8 = vadd.f32 %v2821_v5, %v1057_v63  ;;  %1711 = vmatmul.mubr.bf16.gmra.mrb[24].mxu1 %v1431_v58  ;;  %v1323_v9 = vmax.f32 %v1195_v62, 0.0 }
 0x1af   : > { %v1198_v25 = vadd.f32 %v2823_v7, %v1058_v6  ;;  %v1324_v50 = vmax.f32 %v1196_v2, 0.0 }
 0x1b0   : > { %v1325_v10 = vmax.f32 %v1197_v8, 0.0 }
 0x1b1   : > { %v1326_v11 = vmax.f32 %v1198_v25, 0.0  ;;  %v788_v12 = vpop.f32.mrb[40].mxu0 }
 0x1b2   : > { %v1059_v13 = vmul.f32 %v2816_v3, %v788_v12  ;;  %v790_v14 = vpop.f32.mrb[41].mxu0  ;;  %v1433_v15 = vpack.c.bf16 %v1325_v10, %v1323_v9 }
 0x1b3   : > { %v1060_v16 = vmul.f32 %v2818_v4, %v790_v14  ;;  %v792_v17 = vpop.f32.mrb[42].mxu0  ;;  %v1434_v18 = vpack.c.bf16 %v1326_v11, %v1324_v50 }
 0x1b4   : > { %v1199_v19 = vadd.f32 %v2821_v5, %v1059_v13  ;;  %v1061_v20 = vmul.f32 %v2816_v3, %v792_v17  ;;  %v794_v21 = vpop.f32.mrb[43].mxu0 }
 0x1b5   : > { %v1200_v22 = vadd.f32 %v2823_v7, %v1060_v16  ;;  %v1062_v23 = vmul.f32 %v2818_v4, %v794_v21  ;;  %1718 = vmatprep.mubr.bf16.mxu1 %v1434_v18 }
 0x1b6   : > { %v1201_v24 = vadd.f32 %v2821_v5, %v1061_v20  ;;  %1719 = vmatmul.mubr.bf16.gmra.mrb[28].mxu1 %v1433_v15  ;;  %v1327_v47 = vmax.f32 %v1199_v19, 0.0 }
 0x1b7   : > { %v1202_v26 = vadd.f32 %v2823_v7, %v1062_v23  ;;  %v1328_v28 = vmax.f32 %v1200_v22, 0.0 }
 0x1b8   : > { %v1329_v27 = vmax.f32 %v1201_v24, 0.0 }
 0x1b9   : > { %v1330_v29 = vmax.f32 %v1202_v26, 0.0  ;;  %v798_v30 = vpop.f32.mrb[44].mxu0 }
 0x1ba   : > { %v1063_v32 = vmul.f32 %v2816_v3, %v798_v30  ;;  %v800_v33 = vpop.f32.mrb[45].mxu0  ;;  %v1435_v34 = vpack.c.bf16 %v1329_v27, %v1327_v47 }
 0x1bb   : > { %v1064_v0 = vmul.f32 %v2818_v4, %v800_v33  ;;  %v802_v35 = vpop.f32.mrb[46].mxu0  ;;  %v1436_v36 = vpack.c.bf16 %v1330_v29, %v1328_v28 }
 0x1bc   : > { %v1203_v37 = vadd.f32 %v2821_v5, %v1063_v32  ;;  %v1065_v38 = vmul.f32 %v2816_v3, %v802_v35  ;;  %v804_v39 = vpop.f32.mrb[47].mxu0 }
 0x1bd   : > { %v1204_v40 = vadd.f32 %v2823_v7, %v1064_v0  ;;  %v1066_v41 = vmul.f32 %v2818_v4, %v804_v39  ;;  %1726 = vmatprep.mubr.bf16.mxu1 %v1436_v36 }
 0x1be   : > { %v1205_v42 = vadd.f32 %v2821_v5, %v1065_v38  ;;  %1727 = vmatmul.mubr.bf16.gmra.mrb[32].mxu1 %v1435_v34  ;;  %v1331_v44 = vmax.f32 %v1203_v37, 0.0 }
 0x1bf   : > { %v1206_v43 = vadd.f32 %v2823_v7, %v1066_v41  ;;  %v1332_v46 = vmax.f32 %v1204_v40, 0.0 }
 0x1c0   : > { %v1333_v45 = vmax.f32 %v1205_v42, 0.0 }
 0x1c1   : > { %v1334_v48 = vmax.f32 %v1206_v43, 0.0  ;;  %v808_v49 = vpop.f32.mrb[48].mxu0 }
 0x1c2   : > { %v1067_v51 = vmul.f32 %v2816_v3, %v808_v49  ;;  %v810_v52 = vpop.f32.mrb[49].mxu0  ;;  %v1437_v53 = vpack.c.bf16 %v1333_v45, %v1331_v44 }
 0x1c3   : > { %v1068_v31 = vmul.f32 %v2818_v4, %v810_v52  ;;  %v812_v54 = vpop.f32.mrb[50].mxu0  ;;  %v1438_v55 = vpack.c.bf16 %v1334_v48, %v1332_v46 }
 0x1c4   : > { %v1207_v56 = vadd.f32 %v2821_v5, %v1067_v51  ;;  %v1069_v57 = vmul.f32 %v2816_v3, %v812_v54  ;;  %v814_v58 = vpop.f32.mrb[51].mxu0 }
 0x1c5   : > { %v1208_v59 = vadd.f32 %v2823_v7, %v1068_v31  ;;  %v1070_v60 = vmul.f32 %v2818_v4, %v814_v58  ;;  %1734 = vmatprep.mubr.bf16.mxu1 %v1438_v55 }
 0x1c6   : > { %v1209_v61 = vadd.f32 %v2821_v5, %v1069_v57  ;;  %1735 = vmatmul.mubr.bf16.gmra.mrb[36].mxu1 %v1437_v53  ;;  %v1335_v63 = vmax.f32 %v1207_v56, 0.0 }
 0x1c7   : > { %v1210_v62 = vadd.f32 %v2823_v7, %v1070_v60  ;;  %v1336_v2 = vmax.f32 %v1208_v59, 0.0 }
 0x1c8   : > { %v1337_v1 = vmax.f32 %v1209_v61, 0.0 }
 0x1c9   : > { %v1338_v6 = vmax.f32 %v1210_v62, 0.0  ;;  %v818_v8 = vpop.f32.mrb[52].mxu0 }
 0x1ca   : > { %v1071_v25 = vmul.f32 %v2816_v3, %v818_v8  ;;  %v820_v9 = vpop.f32.mrb[53].mxu0  ;;  %v1439_v10 = vpack.c.bf16 %v1337_v1, %v1335_v63 }
 0x1cb   : > { %v1072_v50 = vmul.f32 %v2818_v4, %v820_v9  ;;  %v822_v11 = vpop.f32.mrb[54].mxu0  ;;  %v1440_v12 = vpack.c.bf16 %v1338_v6, %v1336_v2 }
 0x1cc   : > { %v1211_v13 = vadd.f32 %v2821_v5, %v1071_v25  ;;  %v1073_v14 = vmul.f32 %v2816_v3, %v822_v11  ;;  %v824_v15 = vpop.f32.mrb[55].mxu0 }
 0x1cd   : > { %v1212_v16 = vadd.f32 %v2823_v7, %v1072_v50  ;;  %v1074_v17 = vmul.f32 %v2818_v4, %v824_v15  ;;  %1742 = vmatprep.mubr.bf16.mxu1 %v1440_v12 }
 0x1ce   : > { %v1213_v18 = vadd.f32 %v2821_v5, %v1073_v14  ;;  %1743 = vmatmul.mubr.bf16.gmra.mrb[40].mxu1 %v1439_v10  ;;  %v1339_v20 = vmax.f32 %v1211_v13, 0.0 }
 0x1cf   : > { %v1214_v19 = vadd.f32 %v2823_v7, %v1074_v17  ;;  %v1340_v22 = vmax.f32 %v1212_v16, 0.0 }
 0x1d0   : > { %v1341_v21 = vmax.f32 %v1213_v18, 0.0 }
 0x1d1   : > { %v1342_v23 = vmax.f32 %v1214_v19, 0.0  ;;  %v828_v24 = vpop.f32.mrb[56].mxu0 }
 0x1d2   : > { %v1075_v26 = vmul.f32 %v2816_v3, %v828_v24  ;;  %v830_v47 = vpop.f32.mrb[57].mxu0  ;;  %v1441_v27 = vpack.c.bf16 %v1341_v21, %v1339_v20 }
 0x1d3   : > { %v1076_v28 = vmul.f32 %v2818_v4, %v830_v47  ;;  %v832_v29 = vpop.f32.mrb[58].mxu0  ;;  %v1442_v30 = vpack.c.bf16 %v1342_v23, %v1340_v22 }
 0x1d4   : > { %v1215_v32 = vadd.f32 %v2821_v5, %v1075_v26  ;;  %v1077_v33 = vmul.f32 %v2816_v3, %v832_v29  ;;  %v834_v34 = vpop.f32.mrb[59].mxu0 }
 0x1d5   : > { %v1216_v0 = vadd.f32 %v2823_v7, %v1076_v28  ;;  %v1078_v35 = vmul.f32 %v2818_v4, %v834_v34  ;;  %1750 = vmatprep.mubr.bf16.mxu1 %v1442_v30 }
 0x1d6   : > { %v1217_v36 = vadd.f32 %v2821_v5, %v1077_v33  ;;  %1751 = vmatmul.mubr.bf16.gmra.mrb[44].mxu1 %v1441_v27  ;;  %v1343_v38 = vmax.f32 %v1215_v32, 0.0 }
 0x1d7   : > { %v1218_v37 = vadd.f32 %v2823_v7, %v1078_v35  ;;  %v1344_v40 = vmax.f32 %v1216_v0, 0.0 }
 0x1d8   : > { %v1345_v39 = vmax.f32 %v1217_v36, 0.0 }
 0x1d9   : > { %v1346_v41 = vmax.f32 %v1218_v37, 0.0  ;;  %v838_v42 = vpop.f32.mrb[60].mxu0 }
 0x1da   : > { %v1079_v43 = vmul.f32 %v2816_v3, %v838_v42  ;;  %v840_v44 = vpop.f32.mrb[61].mxu0  ;;  %v1443_v45 = vpack.c.bf16 %v1345_v39, %v1343_v38 }
 0x1db   : > { %v1080_v46 = vmul.f32 %v2818_v4, %v840_v44  ;;  %v842_v48 = vpop.f32.mrb[62].mxu0  ;;  %v1444_v49 = vpack.c.bf16 %v1346_v41, %v1344_v40 }
 0x1dc   : > { %v1219_v51 = vadd.f32 %v2821_v5, %v1079_v43  ;;  %v1081_v52 = vmul.f32 %v2816_v3, %v842_v48  ;;  %v844_v53 = vpop.f32.mrb[63].mxu0 }
 0x1dd   : > { %v1220_v31 = vadd.f32 %v2823_v7, %v1080_v46  ;;  %v1082_v54 = vmul.f32 %v2818_v4, %v844_v53  ;;  %1758 = vmatprep.mubr.bf16.mxu1 %v1444_v49 }
 0x1de   : > { %v1221_v55 = vadd.f32 %v2821_v5, %v1081_v52  ;;  %1759 = vmatmul.mubr.bf16.gmra.mrb[48].mxu1 %v1443_v45  ;;  %v1347_v57 = vmax.f32 %v1219_v51, 0.0 }
 0x1df   : > { %v1222_v56 = vadd.f32 %v2823_v7, %v1082_v54  ;;  %v1348_v59 = vmax.f32 %v1220_v31, 0.0 }
 0x1e0   : > { %v1349_v58 = vmax.f32 %v1221_v55, 0.0 }
 0x1e1   : > { %v1350_v60 = vmax.f32 %v1222_v56, 0.0  ;;  %v848_v61 = vpop.f32.mrb[64].mxu0 }
 0x1e2   : > { %v1083_v62 = vmul.f32 %v2816_v3, %v848_v61  ;;  %v850_v63 = vpop.f32.mrb[65].mxu0  ;;  %v1445_v1 = vpack.c.bf16 %v1349_v58, %v1347_v57 }
 0x1e3   : > { %v1084_v2 = vmul.f32 %v2818_v4, %v850_v63  ;;  %v852_v6 = vpop.f32.mrb[66].mxu0  ;;  %v1446_v8 = vpack.c.bf16 %v1350_v60, %v1348_v59 }
 0x1e4   : > { %v1223_v25 = vadd.f32 %v2821_v5, %v1083_v62  ;;  %v1085_v9 = vmul.f32 %v2816_v3, %v852_v6  ;;  %v854_v10 = vpop.f32.mrb[67].mxu0 }
 0x1e5   : > { %v1224_v50 = vadd.f32 %v2823_v7, %v1084_v2  ;;  %v1086_v11 = vmul.f32 %v2818_v4, %v854_v10  ;;  %1766 = vmatprep.mubr.bf16.mxu1 %v1446_v8 }
 0x1e6   : > { %v1225_v12 = vadd.f32 %v2821_v5, %v1085_v9  ;;  %1767 = vmatmul.mubr.bf16.gmra.mrb[52].mxu1 %v1445_v1  ;;  %v1351_v14 = vmax.f32 %v1223_v25, 0.0 }
 0x1e7   : > { %v1226_v13 = vadd.f32 %v2823_v7, %v1086_v11  ;;  %v1352_v16 = vmax.f32 %v1224_v50, 0.0 }
 0x1e8   : > { %v1353_v15 = vmax.f32 %v1225_v12, 0.0 }
 0x1e9   : > { %v1354_v17 = vmax.f32 %v1226_v13, 0.0  ;;  %v858_v18 = vpop.f32.mrb[68].mxu0 }
 0x1ea   : > { %v1087_v19 = vmul.f32 %v2816_v3, %v858_v18  ;;  %v860_v20 = vpop.f32.mrb[69].mxu0  ;;  %v1447_v21 = vpack.c.bf16 %v1353_v15, %v1351_v14 }
 0x1eb   : > { %v1088_v22 = vmul.f32 %v2818_v4, %v860_v20  ;;  %v862_v23 = vpop.f32.mrb[70].mxu0  ;;  %v1448_v24 = vpack.c.bf16 %v1354_v17, %v1352_v16 }
 0x1ec   : > { %v1227_v26 = vadd.f32 %v2821_v5, %v1087_v19  ;;  %v1089_v47 = vmul.f32 %v2816_v3, %v862_v23  ;;  %v864_v27 = vpop.f32.mrb[71].mxu0 }
 0x1ed   : > { %v1228_v28 = vadd.f32 %v2823_v7, %v1088_v22  ;;  %v1090_v29 = vmul.f32 %v2818_v4, %v864_v27  ;;  %1774 = vmatprep.mubr.bf16.mxu1 %v1448_v24 }
 0x1ee   : > { %v1229_v30 = vadd.f32 %v2821_v5, %v1089_v47  ;;  %1775 = vmatmul.mubr.bf16.gmra.mrb[56].mxu1 %v1447_v21  ;;  %v1355_v33 = vmax.f32 %v1227_v26, 0.0 }
 0x1ef   : > { %v1230_v32 = vadd.f32 %v2823_v7, %v1090_v29  ;;  %v1356_v0 = vmax.f32 %v1228_v28, 0.0 }
 0x1f0   : > { %v1357_v34 = vmax.f32 %v1229_v30, 0.0 }
 0x1f1   : > { %v1358_v35 = vmax.f32 %v1230_v32, 0.0  ;;  %v868_v36 = vpop.f32.mrb[72].mxu0 }
 0x1f2   : > { %v1091_v37 = vmul.f32 %v2816_v3, %v868_v36  ;;  %v870_v38 = vpop.f32.mrb[73].mxu0  ;;  %v1449_v39 = vpack.c.bf16 %v1357_v34, %v1355_v33 }
 0x1f3   : > { %v1092_v40 = vmul.f32 %v2818_v4, %v870_v38  ;;  %v872_v41 = vpop.f32.mrb[74].mxu0  ;;  %v1450_v42 = vpack.c.bf16 %v1358_v35, %v1356_v0 }
 0x1f4   : > { %v1231_v43 = vadd.f32 %v2821_v5, %v1091_v37  ;;  %v1093_v44 = vmul.f32 %v2816_v3, %v872_v41  ;;  %v874_v45 = vpop.f32.mrb[75].mxu0 }
 0x1f5   : > { %v1232_v46 = vadd.f32 %v2823_v7, %v1092_v40  ;;  %v1094_v48 = vmul.f32 %v2818_v4, %v874_v45  ;;  %1782 = vmatprep.mubr.bf16.mxu1 %v1450_v42 }
 0x1f6   : > { %v1233_v49 = vadd.f32 %v2821_v5, %v1093_v44  ;;  %1783 = vmatmul.mubr.bf16.gmra.mrb[60].mxu1 %v1449_v39  ;;  %v1359_v52 = vmax.f32 %v1231_v43, 0.0 }
 0x1f7   : > { %v1234_v51 = vadd.f32 %v2823_v7, %v1094_v48  ;;  %v1360_v31 = vmax.f32 %v1232_v46, 0.0 }
 0x1f8   : > { %v1361_v53 = vmax.f32 %v1233_v49, 0.0 }
 0x1f9   : > { %v1362_v54 = vmax.f32 %v1234_v51, 0.0  ;;  %v878_v55 = vpop.f32.mrb[76].mxu0 }
 0x1fa   : > { %v1095_v56 = vmul.f32 %v2816_v3, %v878_v55  ;;  %v880_v57 = vpop.f32.mrb[77].mxu0  ;;  %v1451_v58 = vpack.c.bf16 %v1361_v53, %v1359_v52 }
 0x1fb   : > { %v1096_v59 = vmul.f32 %v2818_v4, %v880_v57  ;;  %v882_v60 = vpop.f32.mrb[78].mxu0  ;;  %v1452_v61 = vpack.c.bf16 %v1362_v54, %v1360_v31 }
 0x1fc   : > { %v1235_v62 = vadd.f32 %v2821_v5, %v1095_v56  ;;  %v1097_v63 = vmul.f32 %v2816_v3, %v882_v60  ;;  %v884_v1 = vpop.f32.mrb[79].mxu0 }
 0x1fd   : > { %v1236_v2 = vadd.f32 %v2823_v7, %v1096_v59  ;;  %v1098_v6 = vmul.f32 %v2818_v4, %v884_v1  ;;  %1790 = vmatprep.mubr.bf16.mxu1 %v1452_v61 }
 0x1fe   : > { %v1237_v8 = vadd.f32 %v2821_v5, %v1097_v63  ;;  %1791 = vmatmul.mubr.bf16.gmra.mrb[64].mxu1 %v1451_v58  ;;  %v1363_v9 = vmax.f32 %v1235_v62, 0.0 }
 0x1ff   : > { %v1238_v25 = vadd.f32 %v2823_v7, %v1098_v6  ;;  %v1364_v50 = vmax.f32 %v1236_v2, 0.0 }
 0x200   : > { %v1365_v10 = vmax.f32 %v1237_v8, 0.0 }
 0x201   : > { %v1366_v11 = vmax.f32 %v1238_v25, 0.0  ;;  %v888_v12 = vpop.f32.mrb[80].mxu0 }
 0x202   : > { %v1099_v13 = vmul.f32 %v2816_v3, %v888_v12  ;;  %v890_v14 = vpop.f32.mrb[81].mxu0  ;;  %v1453_v15 = vpack.c.bf16 %v1365_v10, %v1363_v9 }
 0x203   : > { %v1100_v16 = vmul.f32 %v2818_v4, %v890_v14  ;;  %v892_v17 = vpop.f32.mrb[82].mxu0  ;;  %v1454_v18 = vpack.c.bf16 %v1366_v11, %v1364_v50 }
 0x204   : > { %v1239_v19 = vadd.f32 %v2821_v5, %v1099_v13  ;;  %v1101_v20 = vmul.f32 %v2816_v3, %v892_v17  ;;  %v894_v21 = vpop.f32.mrb[83].mxu0 }
 0x205   : > { %v1240_v22 = vadd.f32 %v2823_v7, %v1100_v16  ;;  %v1102_v23 = vmul.f32 %v2818_v4, %v894_v21  ;;  %1798 = vmatprep.mubr.bf16.mxu1 %v1454_v18 }
 0x206   : > { %v1241_v24 = vadd.f32 %v2821_v5, %v1101_v20  ;;  %1799 = vmatmul.mubr.bf16.gmra.mrb[68].mxu1 %v1453_v15  ;;  %v1367_v47 = vmax.f32 %v1239_v19, 0.0 }
 0x207   : > { %v1242_v26 = vadd.f32 %v2823_v7, %v1102_v23  ;;  %v1368_v28 = vmax.f32 %v1240_v22, 0.0 }
 0x208   : > { %v1369_v27 = vmax.f32 %v1241_v24, 0.0 }
 0x209   : > { %v1370_v29 = vmax.f32 %v1242_v26, 0.0  ;;  %v898_v30 = vpop.f32.mrb[84].mxu0 }
 0x20a   : > { %v1103_v32 = vmul.f32 %v2816_v3, %v898_v30  ;;  %v900_v33 = vpop.f32.mrb[85].mxu0  ;;  %v1455_v34 = vpack.c.bf16 %v1369_v27, %v1367_v47 }
 0x20b   : > { %v1104_v0 = vmul.f32 %v2818_v4, %v900_v33  ;;  %v902_v35 = vpop.f32.mrb[86].mxu0  ;;  %v1456_v36 = vpack.c.bf16 %v1370_v29, %v1368_v28 }
 0x20c   : > { %v1243_v37 = vadd.f32 %v2821_v5, %v1103_v32  ;;  %v1105_v38 = vmul.f32 %v2816_v3, %v902_v35  ;;  %v904_v39 = vpop.f32.mrb[87].mxu0 }
 0x20d   : > { %v1244_v40 = vadd.f32 %v2823_v7, %v1104_v0  ;;  %v1106_v41 = vmul.f32 %v2818_v4, %v904_v39  ;;  %1806 = vmatprep.mubr.bf16.mxu1 %v1456_v36 }
 0x20e   : > { %v1245_v42 = vadd.f32 %v2821_v5, %v1105_v38  ;;  %1807 = vmatmul.mubr.bf16.gmra.mrb[72].mxu1 %v1455_v34  ;;  %v1371_v44 = vmax.f32 %v1243_v37, 0.0 }
 0x20f   : > { %v1246_v43 = vadd.f32 %v2823_v7, %v1106_v41  ;;  %v1372_v46 = vmax.f32 %v1244_v40, 0.0 }
 0x210   : > { %v1373_v45 = vmax.f32 %v1245_v42, 0.0 }
 0x211   : > { %v1374_v48 = vmax.f32 %v1246_v43, 0.0  ;;  %v908_v49 = vpop.f32.mrb[88].mxu0 }
 0x212   : > { %v1107_v51 = vmul.f32 %v2816_v3, %v908_v49  ;;  %v910_v52 = vpop.f32.mrb[89].mxu0  ;;  %v1457_v53 = vpack.c.bf16 %v1373_v45, %v1371_v44 }
 0x213   : > { %v1108_v31 = vmul.f32 %v2818_v4, %v910_v52  ;;  %v912_v54 = vpop.f32.mrb[90].mxu0  ;;  %v1458_v55 = vpack.c.bf16 %v1374_v48, %v1372_v46 }
 0x214   : > { %v1247_v56 = vadd.f32 %v2821_v5, %v1107_v51  ;;  %v1109_v57 = vmul.f32 %v2816_v3, %v912_v54  ;;  %v914_v58 = vpop.f32.mrb[91].mxu0 }
 0x215   : > { %v1248_v59 = vadd.f32 %v2823_v7, %v1108_v31  ;;  %v1110_v60 = vmul.f32 %v2818_v4, %v914_v58  ;;  %1814 = vmatprep.mubr.bf16.mxu1 %v1458_v55 }
 0x216   : > { %v1249_v61 = vadd.f32 %v2821_v5, %v1109_v57  ;;  %1815 = vmatmul.mubr.bf16.gmra.mrb[76].mxu1 %v1457_v53  ;;  %v1375_v63 = vmax.f32 %v1247_v56, 0.0 }
 0x217   : > { %v1250_v62 = vadd.f32 %v2823_v7, %v1110_v60  ;;  %v1376_v2 = vmax.f32 %v1248_v59, 0.0 }
 0x218   : > { %v1377_v1 = vmax.f32 %v1249_v61, 0.0 }
 0x219   : > { %v1378_v6 = vmax.f32 %v1250_v62, 0.0  ;;  %v918_v8 = vpop.f32.mrb[92].mxu0 }
 0x21a   : > { %v1111_v25 = vmul.f32 %v2816_v3, %v918_v8  ;;  %v920_v9 = vpop.f32.mrb[93].mxu0  ;;  %v1459_v10 = vpack.c.bf16 %v1377_v1, %v1375_v63 }
 0x21b   : > { %v1112_v50 = vmul.f32 %v2818_v4, %v920_v9  ;;  %v922_v11 = vpop.f32.mrb[94].mxu0  ;;  %v1460_v12 = vpack.c.bf16 %v1378_v6, %v1376_v2 }
 0x21c   : > { %v1251_v13 = vadd.f32 %v2821_v5, %v1111_v25  ;;  %v1113_v14 = vmul.f32 %v2816_v3, %v922_v11  ;;  %v924_v15 = vpop.f32.mrb[95].mxu0 }
 0x21d   : > { %v1252_v16 = vadd.f32 %v2823_v7, %v1112_v50  ;;  %v1114_v17 = vmul.f32 %v2818_v4, %v924_v15  ;;  %1822 = vmatprep.mubr.bf16.mxu1 %v1460_v12 }
 0x21e   : > { %v1253_v18 = vadd.f32 %v2821_v5, %v1113_v14  ;;  %1823 = vmatmul.mubr.bf16.gmra.mrb[80].mxu1 %v1459_v10  ;;  %v1379_v20 = vmax.f32 %v1251_v13, 0.0 }
 0x21f   : > { %v1254_v19 = vadd.f32 %v2823_v7, %v1114_v17  ;;  %v1380_v22 = vmax.f32 %v1252_v16, 0.0 }
 0x220   : > { %v1381_v21 = vmax.f32 %v1253_v18, 0.0 }
 0x221   : > { %v1382_v23 = vmax.f32 %v1254_v19, 0.0  ;;  %v928_v24 = vpop.f32.mrb[96].mxu0 }
 0x222   : > { %v1115_v26 = vmul.f32 %v2816_v3, %v928_v24  ;;  %v930_v47 = vpop.f32.mrb[97].mxu0  ;;  %v1461_v27 = vpack.c.bf16 %v1381_v21, %v1379_v20 }
 0x223   : > { %v1116_v28 = vmul.f32 %v2818_v4, %v930_v47  ;;  %v932_v29 = vpop.f32.mrb[98].mxu0  ;;  %v1462_v30 = vpack.c.bf16 %v1382_v23, %v1380_v22 }
 0x224   : > { %v1255_v32 = vadd.f32 %v2821_v5, %v1115_v26  ;;  %v1117_v33 = vmul.f32 %v2816_v3, %v932_v29  ;;  %v934_v34 = vpop.f32.mrb[99].mxu0 }
 0x225   : > { %v1256_v0 = vadd.f32 %v2823_v7, %v1116_v28  ;;  %v1118_v35 = vmul.f32 %v2818_v4, %v934_v34  ;;  %1830 = vmatprep.mubr.bf16.mxu1 %v1462_v30 }
 0x226   : > { %v1257_v36 = vadd.f32 %v2821_v5, %v1117_v33  ;;  %1831 = vmatmul.mubr.bf16.gmra.mrb[84].mxu1 %v1461_v27  ;;  %v1383_v38 = vmax.f32 %v1255_v32, 0.0 }
 0x227   : > { %v1258_v37 = vadd.f32 %v2823_v7, %v1118_v35  ;;  %v1384_v40 = vmax.f32 %v1256_v0, 0.0 }
 0x228   : > { %v1385_v39 = vmax.f32 %v1257_v36, 0.0 }
 0x229   : > { %v1386_v41 = vmax.f32 %v1258_v37, 0.0  ;;  %v938_v42 = vpop.f32.mrb[100].mxu0 }
 0x22a   : > { %v1119_v43 = vmul.f32 %v2816_v3, %v938_v42  ;;  %v940_v44 = vpop.f32.mrb[101].mxu0  ;;  %v1463_v45 = vpack.c.bf16 %v1385_v39, %v1383_v38 }
 0x22b   : > { %v1120_v46 = vmul.f32 %v2818_v4, %v940_v44  ;;  %v942_v48 = vpop.f32.mrb[102].mxu0  ;;  %v1464_v49 = vpack.c.bf16 %v1386_v41, %v1384_v40 }
 0x22c   : > { %v1259_v51 = vadd.f32 %v2821_v5, %v1119_v43  ;;  %v1121_v52 = vmul.f32 %v2816_v3, %v942_v48  ;;  %v944_v53 = vpop.f32.mrb[103].mxu0 }
 0x22d   : > { %v1260_v31 = vadd.f32 %v2823_v7, %v1120_v46  ;;  %v1122_v54 = vmul.f32 %v2818_v4, %v944_v53  ;;  %1838 = vmatprep.mubr.bf16.mxu1 %v1464_v49 }
 0x22e   : > { %v1261_v55 = vadd.f32 %v2821_v5, %v1121_v52  ;;  %1839 = vmatmul.mubr.bf16.gmra.mrb[88].mxu1 %v1463_v45  ;;  %v1387_v57 = vmax.f32 %v1259_v51, 0.0 }
 0x22f   : > { %v1262_v56 = vadd.f32 %v2823_v7, %v1122_v54  ;;  %v1388_v59 = vmax.f32 %v1260_v31, 0.0 }
 0x230   : > { %v1389_v58 = vmax.f32 %v1261_v55, 0.0 }
 0x231   : > { %v1390_v60 = vmax.f32 %v1262_v56, 0.0  ;;  %v948_v61 = vpop.f32.mrb[104].mxu0 }
 0x232   : > { %v1123_v62 = vmul.f32 %v2816_v3, %v948_v61  ;;  %v950_v63 = vpop.f32.mrb[105].mxu0  ;;  %v1465_v1 = vpack.c.bf16 %v1389_v58, %v1387_v57 }
 0x233   : > { %v1124_v2 = vmul.f32 %v2818_v4, %v950_v63  ;;  %v952_v6 = vpop.f32.mrb[106].mxu0  ;;  %v1466_v8 = vpack.c.bf16 %v1390_v60, %v1388_v59 }
 0x234   : > { %v1263_v25 = vadd.f32 %v2821_v5, %v1123_v62  ;;  %v1125_v9 = vmul.f32 %v2816_v3, %v952_v6  ;;  %v954_v10 = vpop.f32.mrb[107].mxu0 }
 0x235   : > { %v1264_v50 = vadd.f32 %v2823_v7, %v1124_v2  ;;  %v1126_v11 = vmul.f32 %v2818_v4, %v954_v10  ;;  %1846 = vmatprep.mubr.bf16.mxu1 %v1466_v8 }
 0x236   : > { %v1265_v12 = vadd.f32 %v2821_v5, %v1125_v9  ;;  %1847 = vmatmul.mubr.bf16.gmra.mrb[92].mxu1 %v1465_v1  ;;  %v1391_v14 = vmax.f32 %v1263_v25, 0.0  ;;  %v3090_v9 = vld [vmem:[%s3293_s5] ss:$0 sm:$0xff] }
 0x237   : > { %v1266_v13 = vadd.f32 %v2823_v7, %v1126_v11  ;;  %v1392_v16 = vmax.f32 %v1264_v50, 0.0 }
 0x238   : > { %v1393_v15 = vmax.f32 %v1265_v12, 0.0 }
 0x239   : > { %v1394_v17 = vmax.f32 %v1266_v13, 0.0  ;;  %v958_v18 = vpop.f32.mrb[108].mxu0 }
 0x23a   : > { %v1127_v19 = vmul.f32 %v2816_v3, %v958_v18  ;;  %v960_v20 = vpop.f32.mrb[109].mxu0  ;;  %v1467_v21 = vpack.c.bf16 %v1393_v15, %v1391_v14 }
 0x23b   : > { %v1128_v22 = vmul.f32 %v2818_v4, %v960_v20  ;;  %v962_v23 = vpop.f32.mrb[110].mxu0  ;;  %v1468_v24 = vpack.c.bf16 %v1394_v17, %v1392_v16 }
 0x23c   : > { %v1267_v26 = vadd.f32 %v2821_v5, %v1127_v19  ;;  %v1129_v47 = vmul.f32 %v2816_v3, %v962_v23  ;;  %v964_v27 = vpop.f32.mrb[111].mxu0 }
 0x23d   : > { %v1268_v28 = vadd.f32 %v2823_v7, %v1128_v22  ;;  %v1130_v29 = vmul.f32 %v2818_v4, %v964_v27  ;;  %1854 = vmatprep.mubr.bf16.mxu1 %v1468_v24 }
 0x23e   : > { %v1269_v30 = vadd.f32 %v2821_v5, %v1129_v47  ;;  %1855 = vmatmul.mubr.bf16.gmra.mrb[96].mxu1 %v1467_v21  ;;  %v1395_v33 = vmax.f32 %v1267_v26, 0.0 }
 0x23f   : > { %v1270_v32 = vadd.f32 %v2823_v7, %v1130_v29  ;;  %v1396_v0 = vmax.f32 %v1268_v28, 0.0 }
 0x240   : > { %v1397_v34 = vmax.f32 %v1269_v30, 0.0 }
 0x241   : > { %v1398_v35 = vmax.f32 %v1270_v32, 0.0  ;;  %v968_v36 = vpop.f32.mrb[112].mxu0 }
 0x242   : > { %v1131_v37 = vmul.f32 %v2816_v3, %v968_v36  ;;  %v970_v38 = vpop.f32.mrb[113].mxu0  ;;  %v1469_v39 = vpack.c.bf16 %v1397_v34, %v1395_v33 }
 0x243   : > { %v1132_v40 = vmul.f32 %v2818_v4, %v970_v38  ;;  %v972_v41 = vpop.f32.mrb[114].mxu0  ;;  %v1470_v42 = vpack.c.bf16 %v1398_v35, %v1396_v0 }
 0x244   : > { %v1271_v43 = vadd.f32 %v2821_v5, %v1131_v37  ;;  %v1133_v44 = vmul.f32 %v2816_v3, %v972_v41  ;;  %v974_v45 = vpop.f32.mrb[115].mxu0 }
 0x245   : > { %v1272_v46 = vadd.f32 %v2823_v7, %v1132_v40  ;;  %v1134_v48 = vmul.f32 %v2818_v4, %v974_v45  ;;  %1862 = vmatprep.mubr.bf16.mxu1 %v1470_v42 }
 0x246   : > { %v1273_v49 = vadd.f32 %v2821_v5, %v1133_v44  ;;  %1863 = vmatmul.mubr.bf16.gmra.mrb[100].mxu1 %v1469_v39  ;;  %v1399_v52 = vmax.f32 %v1271_v43, 0.0 }
 0x247   : > { %v1274_v51 = vadd.f32 %v2823_v7, %v1134_v48  ;;  %v1400_v31 = vmax.f32 %v1272_v46, 0.0 }
 0x248   : > { %v1401_v53 = vmax.f32 %v1273_v49, 0.0 }
 0x249   : > { %v1402_v54 = vmax.f32 %v1274_v51, 0.0  ;;  %v978_v55 = vpop.f32.mrb[116].mxu0 }
 0x24a   : > { %v1135_v56 = vmul.f32 %v2816_v3, %v978_v55  ;;  %v980_v57 = vpop.f32.mrb[117].mxu0  ;;  %v1471_v58 = vpack.c.bf16 %v1401_v53, %v1399_v52 }
 0x24b   : > { %v1136_v59 = vmul.f32 %v2818_v4, %v980_v57  ;;  %v982_v60 = vpop.f32.mrb[118].mxu0  ;;  %v1472_v61 = vpack.c.bf16 %v1402_v54, %v1400_v31 }
 0x24c   : > { %v1275_v62 = vadd.f32 %v2821_v5, %v1135_v56  ;;  %v1137_v63 = vmul.f32 %v2816_v3, %v982_v60  ;;  %v984_v1 = vpop.f32.mrb[119].mxu0 }
 0x24d   : > { %v1276_v2 = vadd.f32 %v2823_v7, %v1136_v59  ;;  %v1138_v6 = vmul.f32 %v2818_v4, %v984_v1  ;;  %1870 = vmatprep.mubr.bf16.mxu1 %v1472_v61 }
 0x24e   : > { %v1277_v8 = vadd.f32 %v2821_v5, %v1137_v63  ;;  %1871 = vmatmul.mubr.bf16.gmra.mrb[104].mxu1 %v1471_v58  ;;  %v1403_v10 = vmax.f32 %v1275_v62, 0.0 }
 0x24f   : > { %v1278_v25 = vadd.f32 %v2823_v7, %v1138_v6  ;;  %v1404_v11 = vmax.f32 %v1276_v2, 0.0 }
 0x250   : > { %v1405_v50 = vmax.f32 %v1277_v8, 0.0 }
 0x251   : > { %v1406_v12 = vmax.f32 %v1278_v25, 0.0  ;;  %v988_v13 = vpop.f32.mrb[120].mxu0  ;;  %v1664_v14 = vpop.f32.mrb[0].mxu1 }
 0x252   : > { %v1139_v15 = vmul.f32 %v2816_v3, %v988_v13  ;;  %v1665_v16 = vadd.f32 %v3090_v9, %v1664_v14  ;;  %v990_v17 = vpop.f32.mrb[121].mxu0  ;;  %v1666_v18 = vpop.f32.mrb[1].mxu1  ;;  %v1473_v19 = vpack.c.bf16 %v1405_v50, %v1403_v10 }
 0x253   : > { %v1140_v20 = vmul.f32 %v2818_v4, %v990_v17  ;;  %v992_v21 = vpop.f32.mrb[122].mxu0  ;;  %v1667_v22 = vpop.f32.mrb[2].mxu1  ;;  %v1474_v23 = vpack.c.bf16 %v1406_v12, %v1404_v11 }
 0x254   : > { %v1279_v24 = vadd.f32 %v2821_v5, %v1139_v15  ;;  %1907 = vst [vmem:[%s3096_s30 + $0x20] sm:$0xff] %v1665_v16  ;;  %v1141_v26 = vmul.f32 %v2816_v3, %v992_v21  ;;  %v1668_v47 = vadd.f32 %v3090_v9, %v1667_v22  ;;  %v994_v27 = vpop.f32.mrb[123].mxu0  ;;  %v1669_v28 = vpop.f32.mrb[3].mxu1 }
 0x255   : > { %v1280_v29 = vadd.f32 %v2823_v7, %v1140_v20  ;;  %v1142_v30 = vmul.f32 %v2818_v4, %v994_v27  ;;  %1878 = vmatprep.mubr.bf16.mxu1 %v1474_v23 }
 0x256   : > { %v1281_v32 = vadd.f32 %v2821_v5, %v1141_v26  ;;  %1908 = vst [vmem:[%s3096_s30 + $0x28] sm:$0xff] %v1668_v47  ;;  %1879 = vmatmul.mubr.bf16.gmra.mrb[108].mxu1 %v1473_v19  ;;  %v1407_v34 = vmax.f32 %v1279_v24, 0.0 }
 0x257   : > { %v1282_v33 = vadd.f32 %v2823_v7, %v1142_v30  ;;  %v1408_v35 = vmax.f32 %v1280_v29, 0.0 }
 0x258   : > { %v1409_v0 = vmax.f32 %v1281_v32, 0.0 }
 0x259   : > { %v1410_v36 = vmax.f32 %v1282_v33, 0.0  ;;  %v998_v37 = vpop.f32.mrb[124].mxu0  ;;  %v1672_v38 = vpop.f32.mrb[4].mxu1 }
 0x25a   : > { %v1143_v39 = vmul.f32 %v2816_v3, %v998_v37  ;;  %v1673_v40 = vadd.f32 %v3090_v9, %v1672_v38  ;;  %v1000_v41 = vpop.f32.mrb[125].mxu0  ;;  %v1674_v42 = vpop.f32.mrb[5].mxu1  ;;  %v1475_v43 = vpack.c.bf16 %v1409_v0, %v1407_v34 }
 0x25b   : > { %v1144_v44 = vmul.f32 %v2818_v4, %v1000_v41  ;;  %v1002_v45 = vpop.f32.mrb[126].mxu0  ;;  %v1675_v46 = vpop.f32.mrb[6].mxu1  ;;  %v1476_v48 = vpack.c.bf16 %v1410_v36, %v1408_v35 }
 0x25c   : > { %v1283_v49 = vadd.f32 %v2821_v5, %v1143_v39  ;;  %1909 = vst [vmem:[%s3096_s30 + $0x30] sm:$0xff] %v1673_v40  ;;  %v1145_v51 = vmul.f32 %v2816_v3, %v1002_v45  ;;  %v1676_v52 = vadd.f32 %v3090_v9, %v1675_v46  ;;  %v1004_v53 = vpop.f32.mrb[127].mxu0  ;;  %v1677_v31 = vpop.f32.mrb[7].mxu1 }
 0x25d   : > { %v1284_v54 = vadd.f32 %v2823_v7, %v1144_v44  ;;  %v1146_v55 = vmul.f32 %v2818_v4, %v1004_v53  ;;  %1886 = vmatprep.mubr.bf16.mxu1 %v1476_v48 }
 0x25e   : > { %v1285_v56 = vadd.f32 %v2821_v5, %v1145_v51  ;;  %1910 = vst [vmem:[%s3096_s30 + $0x38] sm:$0xff] %v1676_v52  ;;  %1887 = vmatmul.mubr.bf16.gmra.mrb[112].mxu1 %v1475_v43  ;;  %v1411_v58 = vmax.f32 %v1283_v49, 0.0 }
 0x25f   : > { %v1286_v57 = vadd.f32 %v2823_v7, %v1146_v55  ;;  %v1412_v3 = vmax.f32 %v1284_v54, 0.0 }
 0x260   : > { %v1413_v59 = vmax.f32 %v1285_v56, 0.0 }
 0x261   : > { %v1414_v60 = vmax.f32 %v1286_v57, 0.0  ;;  %v1648_v61 = vpop.f32.mrb[128].mxu0  ;;  %v1680_v62 = vpop.f32.mrb[8].mxu1 }
 0x262   : > { %v1649_v63 = vadd.f32 %v3090_v9, %v1648_v61  ;;  %v1681_v4 = vadd.f32 %v3090_v9, %v1680_v62  ;;  %v1650_v1 = vpop.f32.mrb[129].mxu0  ;;  %v1682_v5 = vpop.f32.mrb[9].mxu1  ;;  %v1477_v2 = vpack.c.bf16 %v1413_v59, %v1411_v58 }
 0x263   : > { %v1651_v6 = vpop.f32.mrb[130].mxu0  ;;  %v1683_v8 = vpop.f32.mrb[10].mxu1  ;;  %v1478_v25 = vpack.c.bf16 %v1414_v60, %v1412_v3 }
 0x264   : > { %1903 = vst [vmem:[%s3096_s30] sm:$0xff] %v1649_v63  ;;  %1911 = vst [vmem:[%s3096_s30 + $0x40] sm:$0xff] %v1681_v4  ;;  %v1652_v7 = vadd.f32 %v3090_v9, %v1651_v6  ;;  %v1684_v10 = vadd.f32 %v3090_v9, %v1683_v8  ;;  %v1653_v50 = vpop.f32.mrb[131].mxu0  ;;  %v1685_v11 = vpop.f32.mrb[11].mxu1 }
 0x265   : > { %1894 = vmatprep.mubr.bf16.mxu1 %v1478_v25 }
 0x266   : > { %1904 = vst [vmem:[%s3096_s30 + $0x8] sm:$0xff] %v1652_v7  ;;  %1912 = vst [vmem:[%s3096_s30 + $0x48] sm:$0xff] %v1684_v10  ;;  %1895 = vmatmul.mubr.bf16.gmra.mrb[116].mxu1 %v1477_v2 }
 0x269   : > { %v1656_v12 = vpop.f32.mrb[132].mxu0  ;;  %v1688_v13 = vpop.f32.mrb[12].mxu1 }
 0x26a   : > { %v1657_v14 = vadd.f32 %v3090_v9, %v1656_v12  ;;  %v1689_v15 = vadd.f32 %v3090_v9, %v1688_v13  ;;  %v1658_v16 = vpop.f32.mrb[133].mxu0  ;;  %v1690_v17 = vpop.f32.mrb[13].mxu1 }
 0x26b   : > { %v1659_v18 = vpop.f32.mrb[134].mxu0  ;;  %v1691_v19 = vpop.f32.mrb[14].mxu1 }
 0x26c   : > { %1905 = vst [vmem:[%s3096_s30 + $0x10] sm:$0xff] %v1657_v14  ;;  %1913 = vst [vmem:[%s3096_s30 + $0x50] sm:$0xff] %v1689_v15  ;;  %v1660_v20 = vadd.f32 %v3090_v9, %v1659_v18  ;;  %v1692_v21 = vadd.f32 %v3090_v9, %v1691_v19  ;;  %v1661_v22 = vpop.f32.mrb[135].mxu0  ;;  %v1693_v23 = vpop.f32.mrb[15].mxu1 }
 0x26e   : > { %1906 = vst [vmem:[%s3096_s30 + $0x18] sm:$0xff] %v1660_v20  ;;  %1914 = vst [vmem:[%s3096_s30 + $0x58] sm:$0xff] %v1692_v21 }
 0x271   : > { %v1696_v24 = vpop.f32.mrb[16].mxu1 }
 0x272   : > { %v1697_v26 = vadd.f32 %v3090_v9, %v1696_v24  ;;  %v1698_v47 = vpop.f32.mrb[17].mxu1 }
 0x273   : > { %v1699_v27 = vpop.f32.mrb[18].mxu1 }
 0x274   : > { %1915 = vst [vmem:[%s3096_s30 + $0x60] sm:$0xff] %v1697_v26  ;;  %v1700_v28 = vadd.f32 %v3090_v9, %v1699_v27  ;;  %v1701_v29 = vpop.f32.mrb[19].mxu1 }
 0x276   : > { %1916 = vst [vmem:[%s3096_s30 + $0x68] sm:$0xff] %v1700_v28 }
 0x279   : > { %v1704_v30 = vpop.f32.mrb[20].mxu1 }
 0x27a   : > { %v1705_v32 = vadd.f32 %v3090_v9, %v1704_v30  ;;  %v1706_v33 = vpop.f32.mrb[21].mxu1 }
 0x27b   : > { %v1707_v34 = vpop.f32.mrb[22].mxu1 }
 0x27c   : > { %1917 = vst [vmem:[%s3096_s30 + $0x70] sm:$0xff] %v1705_v32  ;;  %v1708_v0 = vadd.f32 %v3090_v9, %v1707_v34  ;;  %v1709_v35 = vpop.f32.mrb[23].mxu1 }
 0x27e   : > { %1918 = vst [vmem:[%s3096_s30 + $0x78] sm:$0xff] %v1708_v0 }
 0x281   : > { %v1712_v36 = vpop.f32.mrb[24].mxu1 }
 0x282   : > { %v1713_v37 = vadd.f32 %v3090_v9, %v1712_v36  ;;  %v1714_v38 = vpop.f32.mrb[25].mxu1 }
 0x283   : > { %v1715_v39 = vpop.f32.mrb[26].mxu1 }
 0x284   : > { %1919 = vst [vmem:[%s3096_s30 + $0x80] sm:$0xff] %v1713_v37  ;;  %v1716_v40 = vadd.f32 %v3090_v9, %v1715_v39  ;;  %v1717_v41 = vpop.f32.mrb[27].mxu1 }
 0x286   : > { %1920 = vst [vmem:[%s3096_s30 + $0x88] sm:$0xff] %v1716_v40 }
 0x289   : > { %v1720_v42 = vpop.f32.mrb[28].mxu1 }
 0x28a   : > { %v1721_v43 = vadd.f32 %v3090_v9, %v1720_v42  ;;  %v1722_v44 = vpop.f32.mrb[29].mxu1 }
 0x28b   : > { %v1723_v45 = vpop.f32.mrb[30].mxu1 }
 0x28c   : > { %1921 = vst [vmem:[%s3096_s30 + $0x90] sm:$0xff] %v1721_v43  ;;  %v1724_v46 = vadd.f32 %v3090_v9, %v1723_v45  ;;  %v1725_v48 = vpop.f32.mrb[31].mxu1 }
 0x28e   : > { %1922 = vst [vmem:[%s3096_s30 + $0x98] sm:$0xff] %v1724_v46 }
 0x291   : > { %v1728_v49 = vpop.f32.mrb[32].mxu1 }
 0x292   : > { %v1729_v51 = vadd.f32 %v3090_v9, %v1728_v49  ;;  %v1730_v52 = vpop.f32.mrb[33].mxu1 }
 0x293   : > { %v1731_v53 = vpop.f32.mrb[34].mxu1 }
 0x294   : > { %1923 = vst [vmem:[%s3096_s30 + $0xa0] sm:$0xff] %v1729_v51  ;;  %v1732_v31 = vadd.f32 %v3090_v9, %v1731_v53  ;;  %v1733_v54 = vpop.f32.mrb[35].mxu1 }
 0x296   : > { %1924 = vst [vmem:[%s3096_s30 + $0xa8] sm:$0xff] %v1732_v31 }
 0x299   : > { %v1736_v55 = vpop.f32.mrb[36].mxu1 }
 0x29a   : > { %v1737_v56 = vadd.f32 %v3090_v9, %v1736_v55  ;;  %v1738_v57 = vpop.f32.mrb[37].mxu1 }
 0x29b   : > { %v1739_v58 = vpop.f32.mrb[38].mxu1 }
 0x29c   : > { %1925 = vst [vmem:[%s3096_s30 + $0xb0] sm:$0xff] %v1737_v56  ;;  %v1740_v59 = vadd.f32 %v3090_v9, %v1739_v58  ;;  %v1741_v3 = vpop.f32.mrb[39].mxu1 }
 0x29e   : > { %1926 = vst [vmem:[%s3096_s30 + $0xb8] sm:$0xff] %v1740_v59 }
 0x2a1   : > { %v1744_v60 = vpop.f32.mrb[40].mxu1 }
 0x2a2   : > { %v1745_v61 = vadd.f32 %v3090_v9, %v1744_v60  ;;  %v1746_v62 = vpop.f32.mrb[41].mxu1 }
 0x2a3   : > { %v1747_v63 = vpop.f32.mrb[42].mxu1 }
 0x2a4   : > { %1927 = vst [vmem:[%s3096_s30 + $0xc0] sm:$0xff] %v1745_v61  ;;  %v1748_v4 = vadd.f32 %v3090_v9, %v1747_v63  ;;  %v1749_v1 = vpop.f32.mrb[43].mxu1 }
 0x2a6   : > { %1928 = vst [vmem:[%s3096_s30 + $0xc8] sm:$0xff] %v1748_v4 }
 0x2a9   : > { %v1752_v5 = vpop.f32.mrb[44].mxu1 }
 0x2aa   : > { %v1753_v2 = vadd.f32 %v3090_v9, %v1752_v5  ;;  %v1754_v6 = vpop.f32.mrb[45].mxu1 }
 0x2ab   : > { %v1755_v8 = vpop.f32.mrb[46].mxu1 }
 0x2ac   : > { %1929 = vst [vmem:[%s3096_s30 + $0xd0] sm:$0xff] %v1753_v2  ;;  %v1756_v25 = vadd.f32 %v3090_v9, %v1755_v8  ;;  %v1757_v7 = vpop.f32.mrb[47].mxu1 }
 0x2ae   : > { %1930 = vst [vmem:[%s3096_s30 + $0xd8] sm:$0xff] %v1756_v25 }
 0x2b1   : > { %v1760_v10 = vpop.f32.mrb[48].mxu1 }
 0x2b2   : > { %v1761_v50 = vadd.f32 %v3090_v9, %v1760_v10  ;;  %v1762_v11 = vpop.f32.mrb[49].mxu1 }
 0x2b3   : > { %v1763_v12 = vpop.f32.mrb[50].mxu1 }
 0x2b4   : > { %1931 = vst [vmem:[%s3096_s30 + $0xe0] sm:$0xff] %v1761_v50  ;;  %v1764_v13 = vadd.f32 %v3090_v9, %v1763_v12  ;;  %v1765_v14 = vpop.f32.mrb[51].mxu1 }
 0x2b6   : > { %1932 = vst [vmem:[%s3096_s30 + $0xe8] sm:$0xff] %v1764_v13 }
 0x2b9   : > { %v1768_v15 = vpop.f32.mrb[52].mxu1 }
 0x2ba   : > { %v1769_v16 = vadd.f32 %v3090_v9, %v1768_v15  ;;  %v1770_v17 = vpop.f32.mrb[53].mxu1 }
 0x2bb   : > { %v1771_v18 = vpop.f32.mrb[54].mxu1 }
 0x2bc   : > { %1933 = vst [vmem:[%s3096_s30 + $0xf0] sm:$0xff] %v1769_v16  ;;  %v1772_v19 = vadd.f32 %v3090_v9, %v1771_v18  ;;  %v1773_v20 = vpop.f32.mrb[55].mxu1 }
 0x2be   : > { %1934 = vst [vmem:[%s3096_s30 + $0xf8] sm:$0xff] %v1772_v19 }
 0x2c1   : > { %v1776_v21 = vpop.f32.mrb[56].mxu1 }
 0x2c2   : > { %v1777_v22 = vadd.f32 %v3090_v9, %v1776_v21  ;;  %v1778_v23 = vpop.f32.mrb[57].mxu1 }
 0x2c3   : > { %v1779_v24 = vpop.f32.mrb[58].mxu1 }
 0x2c4   : > { %1935 = vst [vmem:[%s3096_s30 + $0x100] sm:$0xff] %v1777_v22  ;;  %v1780_v26 = vadd.f32 %v3090_v9, %v1779_v24  ;;  %v1781_v47 = vpop.f32.mrb[59].mxu1 }
 0x2c6   : > { %1936 = vst [vmem:[%s3096_s30 + $0x108] sm:$0xff] %v1780_v26 }
 0x2c9   : > { %v1784_v27 = vpop.f32.mrb[60].mxu1 }
 0x2ca   : > { %v1785_v28 = vadd.f32 %v3090_v9, %v1784_v27  ;;  %v1786_v29 = vpop.f32.mrb[61].mxu1 }
 0x2cb   : > { %v1787_v30 = vpop.f32.mrb[62].mxu1 }
 0x2cc   : > { %1937 = vst [vmem:[%s3096_s30 + $0x110] sm:$0xff] %v1785_v28  ;;  %v1788_v32 = vadd.f32 %v3090_v9, %v1787_v30  ;;  %v1789_v33 = vpop.f32.mrb[63].mxu1 }
 0x2ce   : > { %1938 = vst [vmem:[%s3096_s30 + $0x118] sm:$0xff] %v1788_v32 }
 0x2d1   : > { %v1792_v34 = vpop.f32.mrb[64].mxu1 }
 0x2d2   : > { %v1793_v0 = vadd.f32 %v3090_v9, %v1792_v34  ;;  %v1794_v35 = vpop.f32.mrb[65].mxu1 }
 0x2d3   : > { %v1795_v36 = vpop.f32.mrb[66].mxu1 }
 0x2d4   : > { %1939 = vst [vmem:[%s3096_s30 + $0x120] sm:$0xff] %v1793_v0  ;;  %v1796_v37 = vadd.f32 %v3090_v9, %v1795_v36  ;;  %v1797_v38 = vpop.f32.mrb[67].mxu1 }
 0x2d6   : > { %1940 = vst [vmem:[%s3096_s30 + $0x128] sm:$0xff] %v1796_v37 }
 0x2d9   : > { %v1800_v39 = vpop.f32.mrb[68].mxu1 }
 0x2da   : > { %v1801_v40 = vadd.f32 %v3090_v9, %v1800_v39  ;;  %v1802_v41 = vpop.f32.mrb[69].mxu1 }
 0x2db   : > { %v1803_v42 = vpop.f32.mrb[70].mxu1 }
 0x2dc   : > { %1941 = vst [vmem:[%s3096_s30 + $0x130] sm:$0xff] %v1801_v40  ;;  %v1804_v43 = vadd.f32 %v3090_v9, %v1803_v42  ;;  %v1805_v44 = vpop.f32.mrb[71].mxu1 }
 0x2de   : > { %1942 = vst [vmem:[%s3096_s30 + $0x138] sm:$0xff] %v1804_v43 }
 0x2e1   : > { %v1808_v45 = vpop.f32.mrb[72].mxu1 }
 0x2e2   : > { %v1809_v46 = vadd.f32 %v3090_v9, %v1808_v45  ;;  %v1810_v48 = vpop.f32.mrb[73].mxu1 }
 0x2e3   : > { %v1811_v49 = vpop.f32.mrb[74].mxu1 }
 0x2e4   : > { %1943 = vst [vmem:[%s3096_s30 + $0x140] sm:$0xff] %v1809_v46  ;;  %v1812_v51 = vadd.f32 %v3090_v9, %v1811_v49  ;;  %v1813_v52 = vpop.f32.mrb[75].mxu1 }
 0x2e6   : > { %1944 = vst [vmem:[%s3096_s30 + $0x148] sm:$0xff] %v1812_v51 }
 0x2e9   : > { %v1816_v53 = vpop.f32.mrb[76].mxu1 }
 0x2ea   : > { %v1817_v31 = vadd.f32 %v3090_v9, %v1816_v53  ;;  %v1818_v54 = vpop.f32.mrb[77].mxu1 }
 0x2eb   : > { %v1819_v55 = vpop.f32.mrb[78].mxu1 }
 0x2ec   : > { %1945 = vst [vmem:[%s3096_s30 + $0x150] sm:$0xff] %v1817_v31  ;;  %v1820_v56 = vadd.f32 %v3090_v9, %v1819_v55  ;;  %v1821_v57 = vpop.f32.mrb[79].mxu1 }
 0x2ee   : > { %1946 = vst [vmem:[%s3096_s30 + $0x158] sm:$0xff] %v1820_v56 }
 0x2f1   : > { %v1824_v58 = vpop.f32.mrb[80].mxu1 }
 0x2f2   : > { %v1825_v59 = vadd.f32 %v3090_v9, %v1824_v58  ;;  %v1826_v3 = vpop.f32.mrb[81].mxu1 }
 0x2f3   : > { %v1827_v60 = vpop.f32.mrb[82].mxu1 }
 0x2f4   : > { %1947 = vst [vmem:[%s3096_s30 + $0x160] sm:$0xff] %v1825_v59  ;;  %v1828_v61 = vadd.f32 %v3090_v9, %v1827_v60  ;;  %v1829_v62 = vpop.f32.mrb[83].mxu1 }
 0x2f6   : > { %1948 = vst [vmem:[%s3096_s30 + $0x168] sm:$0xff] %v1828_v61 }
 0x2f9   : > { %v1832_v63 = vpop.f32.mrb[84].mxu1 }
 0x2fa   : > { %v1833_v4 = vadd.f32 %v3090_v9, %v1832_v63  ;;  %v1834_v1 = vpop.f32.mrb[85].mxu1 }
 0x2fb   : > { %v1835_v5 = vpop.f32.mrb[86].mxu1 }
 0x2fc   : > { %1949 = vst [vmem:[%s3096_s30 + $0x170] sm:$0xff] %v1833_v4  ;;  %v1836_v2 = vadd.f32 %v3090_v9, %v1835_v5  ;;  %v1837_v6 = vpop.f32.mrb[87].mxu1 }
 0x2fe   : > { %1950 = vst [vmem:[%s3096_s30 + $0x178] sm:$0xff] %v1836_v2 }
 0x301   : > { %v1840_v8 = vpop.f32.mrb[88].mxu1 }
 0x302   : > { %v1841_v25 = vadd.f32 %v3090_v9, %v1840_v8  ;;  %v1842_v7 = vpop.f32.mrb[89].mxu1 }
 0x303   : > { %v1843_v10 = vpop.f32.mrb[90].mxu1 }
 0x304   : > { %1951 = vst [vmem:[%s3096_s30 + $0x180] sm:$0xff] %v1841_v25  ;;  %v1844_v50 = vadd.f32 %v3090_v9, %v1843_v10  ;;  %v1845_v11 = vpop.f32.mrb[91].mxu1 }
 0x306   : > { %1952 = vst [vmem:[%s3096_s30 + $0x188] sm:$0xff] %v1844_v50 }
 0x309   : > { %v1848_v12 = vpop.f32.mrb[92].mxu1 }
 0x30a   : > { %v1849_v13 = vadd.f32 %v3090_v9, %v1848_v12  ;;  %v1850_v14 = vpop.f32.mrb[93].mxu1 }
 0x30b   : > { %v1851_v15 = vpop.f32.mrb[94].mxu1 }
 0x30c   : > { %1953 = vst [vmem:[%s3096_s30 + $0x190] sm:$0xff] %v1849_v13  ;;  %v1852_v16 = vadd.f32 %v3090_v9, %v1851_v15  ;;  %v1853_v17 = vpop.f32.mrb[95].mxu1 }
 0x30e   : > { %1954 = vst [vmem:[%s3096_s30 + $0x198] sm:$0xff] %v1852_v16 }
 0x311   : > { %v1856_v18 = vpop.f32.mrb[96].mxu1 }
 0x312   : > { %v1857_v19 = vadd.f32 %v3090_v9, %v1856_v18  ;;  %v1858_v20 = vpop.f32.mrb[97].mxu1 }
 0x313   : > { %v1859_v21 = vpop.f32.mrb[98].mxu1 }
 0x314   : > { %1955 = vst [vmem:[%s3096_s30 + $0x1a0] sm:$0xff] %v1857_v19  ;;  %v1860_v22 = vadd.f32 %v3090_v9, %v1859_v21  ;;  %v1861_v23 = vpop.f32.mrb[99].mxu1 }
 0x316   : > { %1956 = vst [vmem:[%s3096_s30 + $0x1a8] sm:$0xff] %v1860_v22 }
 0x319   : > { %v1864_v24 = vpop.f32.mrb[100].mxu1 }
 0x31a   : > { %v1865_v26 = vadd.f32 %v3090_v9, %v1864_v24  ;;  %v1866_v47 = vpop.f32.mrb[101].mxu1 }
 0x31b   : > { %v1867_v27 = vpop.f32.mrb[102].mxu1 }
 0x31c   : > { %1957 = vst [vmem:[%s3096_s30 + $0x1b0] sm:$0xff] %v1865_v26  ;;  %v1868_v28 = vadd.f32 %v3090_v9, %v1867_v27  ;;  %v1869_v29 = vpop.f32.mrb[103].mxu1 }
 0x31e   : > { %1958 = vst [vmem:[%s3096_s30 + $0x1b8] sm:$0xff] %v1868_v28 }
 0x321   : > { %v1872_v30 = vpop.f32.mrb[104].mxu1 }
 0x322   : > { %v1873_v32 = vadd.f32 %v3090_v9, %v1872_v30  ;;  %v1874_v33 = vpop.f32.mrb[105].mxu1 }
 0x323   : > { %v1875_v34 = vpop.f32.mrb[106].mxu1 }
 0x324   : > { %1959 = vst [vmem:[%s3096_s30 + $0x1c0] sm:$0xff] %v1873_v32  ;;  %v1876_v0 = vadd.f32 %v3090_v9, %v1875_v34  ;;  %v1877_v35 = vpop.f32.mrb[107].mxu1 }
 0x326   : > { %1960 = vst [vmem:[%s3096_s30 + $0x1c8] sm:$0xff] %v1876_v0 }
 0x329   : > { %v1880_v36 = vpop.f32.mrb[108].mxu1 }
 0x32a   : > { %v1881_v37 = vadd.f32 %v3090_v9, %v1880_v36  ;;  %v1882_v38 = vpop.f32.mrb[109].mxu1 }
 0x32b   : > { %v1883_v39 = vpop.f32.mrb[110].mxu1 }
 0x32c   : > { %1961 = vst [vmem:[%s3096_s30 + $0x1d0] sm:$0xff] %v1881_v37  ;;  %v1884_v40 = vadd.f32 %v3090_v9, %v1883_v39  ;;  %v1885_v41 = vpop.f32.mrb[111].mxu1 }
 0x32e   : > { %1962 = vst [vmem:[%s3096_s30 + $0x1d8] sm:$0xff] %v1884_v40 }
 0x331   : > { %v1888_v42 = vpop.f32.mrb[112].mxu1 }
 0x332   : > { %v1889_v43 = vadd.f32 %v3090_v9, %v1888_v42  ;;  %v1890_v44 = vpop.f32.mrb[113].mxu1 }
 0x333   : > { %v1891_v45 = vpop.f32.mrb[114].mxu1 }
 0x334   : > { %1963 = vst [vmem:[%s3096_s30 + $0x1e0] sm:$0xff] %v1889_v43  ;;  %v1892_v46 = vadd.f32 %v3090_v9, %v1891_v45  ;;  %v1893_v48 = vpop.f32.mrb[115].mxu1 }
 0x336   : > { %1964 = vst [vmem:[%s3096_s30 + $0x1e8] sm:$0xff] %v1892_v46 }
 0x339   : > { %v1896_v49 = vpop.f32.mrb[116].mxu1 }
 0x33a   : > { %v1897_v51 = vadd.f32 %v3090_v9, %v1896_v49  ;;  %v1898_v52 = vpop.f32.mrb[117].mxu1 }
 0x33b   : > { %v1899_v53 = vpop.f32.mrb[118].mxu1 }
 0x33c   : > { %1965 = vst [vmem:[%s3096_s30 + $0x1f0] sm:$0xff] %v1897_v51  ;;  %v1900_v31 = vadd.f32 %v3090_v9, %v1899_v53  ;;  %v1901_v54 = vpop.f32.mrb[119].mxu1 }
 0x33e   : > { %1966 = vst [vmem:[%s3096_s30 + $0x1f8] sm:$0xff] %v1900_v31 }
 0x33f   : > { %2435 = shalt.err (!%p2432_p7)
}
 0x340   : > { %s2436_s18 = scalar_lea.hbm %s3240_s7, 8192  ;;  %s2440_s20 = scalar_lea.hbm %s3294_s6, 32768 }
 0x341   : > { %p2437_p9 = scmp.ne.s32.totalorder %s3240_s7, %s2436_s18  ;;  %p2441_p5 = scmp.lt.u32.totalorder %s3240_s7, %s3294_s6 }
 0x342   : > { %p2442_p10 = scmp.lt.u32.totalorder %s2440_s20, %s2436_s18  ;;  %p2444_p1 = scmp.lt.u32.totalorder %s2436_s18, %s3240_s7 }
 0x343   : > { %p2438_p12 = pnand %p2437_p9, %p2658_p6 }
 0x344   : > { %p2443_p11 = por %p2442_p10, %p2441_p5 }
 0x345   : > { %p2439_p0 = pneg %p2438_p12 }
 0x346   : > { %p2445_p2 = por %p2444_p1, %p2443_p11 }
 0x348   : > { %p2446_p4 = pnand %p2445_p2, %p2439_p0 }
 0x34a   : > { %2449 = shalt.err (!%p2446_p4)
}
 0x34b   : > { %s2503_s15 = smov 128   ;;  %s2504_s14 = smov 8  }
 0x34c   : > { %2200 = dma.vmem_to_hbm [thread:$0]  (%p2658_p6), %s3242_s10, 8192, %s3240_s7, %s1968_s25, %s2503_s15, %s2503_s15, %s2504_s14  }
 0x34d PF: > { %p2222_p8 = scmp.ge.s32.totalorder %s2492_s24, 2  ;;  %s1996_s12 = sand.u32 1, %s2480_s21  }
 0x34e   : > { %p3309_p13 = scmp.ne.s32.totalorder %s3299_s28, 0  ;;  %s1997_s27 = scalar_lea.sflag [#allocation4], %s1996_s12 }
 0x350   : > { %p2214_p3 = pnand %p2222_p8, %p3309_p13 }
 0x352   : > { %2475 = dma.done.wait (!%p2214_p3), %s1997_s27, 8192  }
 0x353   : > { %2477 = vsyncadd (!%p2214_p3), %s1997_s27, 4294959104  ;;  %p20_p7 = scmp.ge.s32.totalorder %s2645_s26, 6   ;;  %s3310_s21 = smov %s2484_s22 }
 0x354   : > { %s3311_s22 = smov %s2488_s23  ;;  %s3312_s23 = smov %s2654_s11 }
 0x355   : > { %s3313_s24 = smov %s2645_s26  ;;  %22 = sbr.rel (!%p20_p7) target bundleno = 6 (0x6), region = 97 }
 0x35c   :  { %2002 = vsyncpa [#allocation3], 1 }
 0x35d   :  { %2004 = vsyncpa [#allocation3 + $0x1], 1 }
 0x35e   :  { %2005 = vsyncpa [#allocation6], 1 }
 0x35f   :  { %2006 = vsyncpa [#allocation4], 1 }
 0x360   :  { %2008 = vsyncpa [#allocation4 + $0x1], 1 }

</bundles_post_ra>
